<compile_context>
chip_gen: v5e
topology: v5e:2x2
jax: 0.10.0
libtpu: 0.0.40
codegen_flags: <defaults>
</compile_context>

<pallas_src>
import jax
import jax.numpy as jnp
from jax.experimental import pallas as pl
from jax.experimental.pallas import tpu as pltpu

# ----------------------------- small synthetic CLIP-ViT config -----------------------------
BATCH = 2
CHANNELS = 3
IMG = 16
PATCH = 8
HIDDEN = 32
HEADS = 4
HEAD_DIM = HIDDEN // HEADS
MLP = 64
LAYERS = 2
NUM_PATCHES = (IMG // PATCH) ** 2           # 4
SEQ_REAL = NUM_PATCHES + 1                  # +CLS = 5 real tokens
SEQ = 8                                     # padded to one f32 sublane tile
PATCH_DIM = CHANNELS * PATCH * PATCH        # 192
EPS = 1e-5
NEG_INF = -1e30


# ----------------------------- fused kernel -----------------------------
def _layernorm(x, g, b):
    # f32 row-wise LayerNorm (elementwise math stays f32 on all generations).
    mean = jnp.mean(x, axis=-1, keepdims=True)
    xc = x - mean
    var = jnp.mean(xc * xc, axis=-1, keepdims=True)
    return xc * jax.lax.rsqrt(var + EPS) * g + b


def _clip_encoder_kernel(
    patches_ref, patch_w_ref, embed_add_ref, pre_g_ref, pre_b_ref,
    ln1_g_ref, ln1_b_ref, qkv_w_ref, qkv_b_ref, o_w_ref, o_b_ref,
    ln2_g_ref, ln2_b_ref, fc1_w_ref, fc1_b_ref, fc2_w_ref, fc2_b_ref,
    post_g_ref, post_b_ref,
    out_ref,
):
    # One grid step == one image (grid=(BATCH,), "parallel" -> both TCs on v7x).

    # ---- prologue: patch-conv-as-matmul + CLS/pos add + pre-LayerNorm ----
    emb = jnp.dot(patches_ref[0], patch_w_ref[...],
                  preferred_element_type=jnp.float32)            # (SEQ, H); CLS/pad rows are 0
    x = _layernorm(emb + embed_add_ref[...], pre_g_ref[...], pre_b_ref[...])

    # Key-padding mask generated in-kernel (padded KEY columns -> NEG_INF).
    key_mask = jnp.where(
        jax.lax.broadcasted_iota(jnp.int32, (SEQ, SEQ), 1) >= SEQ_REAL,
        NEG_INF, 0.0).astype(jnp.float32)

    scale = float(HEAD_DIM) ** -0.5

    for l in range(LAYERS):                                       # fully unrolled, static
        # ---------------- attention block (pre-LN) ----------------
        h = _layernorm(x, ln1_g_ref[l], ln1_b_ref[l])
        qkv = jnp.dot(h.astype(jnp.bfloat16), qkv_w_ref[l],
                      preferred_element_type=jnp.float32) + qkv_b_ref[l]   # (SEQ, 3H)
        qkv16 = qkv.astype(jnp.bfloat16)                          # bf16 operands for MXU

        ctx_parts = []
        for hh in range(HEADS):
            c = hh * HEAD_DIM
            q_h = qkv16[:, c:c + HEAD_DIM]
            k_h = qkv16[:, HIDDEN + c:HIDDEN + c + HEAD_DIM]
            v_h = qkv16[:, 2 * HIDDEN + c:2 * HIDDEN + c + HEAD_DIM]
            s = jax.lax.dot_general(q_h, k_h, (((1,), (1,)), ((), ())),
                                    preferred_element_type=jnp.float32)    # (SEQ, SEQ)
            s = s * scale + key_mask
            s = s - jnp.max(s, axis=-1, keepdims=True)
            p = jnp.exp(s)
            p = p * pl.reciprocal(jnp.sum(p, axis=-1, keepdims=True), approx=True)
            ctx_parts.append(jnp.dot(p.astype(jnp.bfloat16), v_h,
                                     preferred_element_type=jnp.float32))  # (SEQ, HEAD_DIM)
        # single out-projection matmul over the lane-concatenated heads
        ctx = jnp.concatenate(ctx_parts, axis=-1).astype(jnp.bfloat16)      # (SEQ, H)
        attn_out = jnp.dot(ctx, o_w_ref[l],
                           preferred_element_type=jnp.float32) + o_b_ref[l]
        x = x + attn_out                                           # residual add

        # ---------------- MLP block (pre-LN, quick-GELU) ----------------
        h2 = _layernorm(x, ln2_g_ref[l], ln2_b_ref[l])
        m = jnp.dot(h2.astype(jnp.bfloat16), fc1_w_ref[l],
                    preferred_element_type=jnp.float32) + fc1_b_ref[l]
        m = m * jax.nn.sigmoid(1.702 * m)                          # CLIP QuickGELU
        x = x + jnp.dot(m.astype(jnp.bfloat16), fc2_w_ref[l],
                        preferred_element_type=jnp.float32) + fc2_b_ref[l]

    # ---- epilogue: pooler_output = post_layernorm(CLS token = row 0) ----
    pooled = _layernorm(x[0:1, :], post_g_ref[...], post_b_ref[...])        # (1, H)
    out_ref[...] = pooled.reshape(out_ref.shape)


# ----------------------------- parameters -----------------------------
def init_params(key):
    std = 0.02

    def nrm(k, shape, dtype=jnp.float32):
        return (std * jax.random.normal(k, shape)).astype(dtype)

    keys = iter(jax.random.split(key, 8))
    return {
        # conv weight reshaped to (C*P*P, HIDDEN); matmul weights stored bf16 (f32 accumulate)
        "patch_w": nrm(next(keys), (PATCH_DIM, HIDDEN), jnp.bfloat16),
        "cls": nrm(next(keys), (HIDDEN,)),
        "pos": nrm(next(keys), (SEQ_REAL, HIDDEN)),
        "pre_ln_g": jnp.ones((1, HIDDEN), jnp.float32),
        "pre_ln_b": jnp.zeros((1, HIDDEN), jnp.float32),
        "post_ln_g": jnp.ones((1, HIDDEN), jnp.float32),
        "post_ln_b": jnp.zeros((1, HIDDEN), jnp.float32),
        # per-layer weights stacked along a leading LAYERS axis (resident in VMEM, unrolled)
        "ln1_g": jnp.ones((LAYERS, 1, HIDDEN), jnp.float32),
        "ln1_b": jnp.zeros((LAYERS, 1, HIDDEN), jnp.float32),
        "qkv_w": nrm(next(keys), (LAYERS, HIDDEN, 3 * HIDDEN), jnp.bfloat16),
        "qkv_b": jnp.zeros((LAYERS, 1, 3 * HIDDEN), jnp.float32),
        "o_w": nrm(next(keys), (LAYERS, HIDDEN, HIDDEN), jnp.bfloat16),
        "o_b": jnp.zeros((LAYERS, 1, HIDDEN), jnp.float32),
        "ln2_g": jnp.ones((LAYERS, 1, HIDDEN), jnp.float32),
        "ln2_b": jnp.zeros((LAYERS, 1, HIDDEN), jnp.float32),
        "fc1_w": nrm(next(keys), (LAYERS, HIDDEN, MLP), jnp.bfloat16),
        "fc1_b": jnp.zeros((LAYERS, 1, MLP), jnp.float32),
        "fc2_w": nrm(next(keys), (LAYERS, MLP, HIDDEN), jnp.bfloat16),
        "fc2_b": jnp.zeros((LAYERS, 1, HIDDEN), jnp.float32),
    }


# ----------------------------- forward pass -----------------------------
def reference_encoder_forward(pixel_values, params):
    """pixel_values: (B, C, H, W) float32 (NCHW, like the PyTorch conv)."""
    B = pixel_values.shape[0]
    assert B == BATCH

    # --- glue: unfold non-overlapping patches (Conv2d k=P,s=P == unfold + matmul).
    #     Row 0 of each image = CLS slot (zeros); rows SEQ_REAL..SEQ-1 = sublane pad (zeros). ---
    g = IMG // PATCH
    p = pixel_values.reshape(B, CHANNELS, g, PATCH, g, PATCH)
    p = p.transpose(0, 2, 4, 1, 3, 5).reshape(B, NUM_PATCHES, PATCH_DIM)
    p = jnp.pad(p, ((0, 0), (1, SEQ - SEQ_REAL), (0, 0)))
    patches = p.astype(jnp.bfloat16)                              # (B, SEQ, PATCH_DIM)

    # --- glue: additive embedding term = pos with cls added at row 0, zero on pad rows ---
    cls_pos = params["pos"].at[0].add(params["cls"])              # (SEQ_REAL, H)
    embed_add = jnp.pad(cls_pos, ((0, SEQ - SEQ_REAL), (0, 0)))   # (SEQ, H)

    def resident(arr):
        # full-array block, same (0,...) index at every grid step -> fetched once, stays in VMEM
        n = arr.ndim
        return pl.BlockSpec(arr.shape, lambda b, n=n: (0,) * n)

    in_specs = [
        pl.BlockSpec((1, SEQ, PATCH_DIM), lambda b: (b, 0, 0)),   # per-image patch slab
        resident(params["patch_w"]),
        resident(embed_add),
        resident(params["pre_ln_g"]), resident(params["pre_ln_b"]),
        resident(params["ln1_g"]), resident(params["ln1_b"]),
        resident(params["qkv_w"]), resident(params["qkv_b"]),
        resident(params["o_w"]), resident(params["o_b"]),
        resident(params["ln2_g"]), resident(params["ln2_b"]),
        resident(params["fc1_w"]), resident(params["fc1_b"]),
        resident(params["fc2_w"]), resident(params["fc2_b"]),
        resident(params["post_ln_g"]), resident(params["post_ln_b"]),
    ]

    pooled = pl.pallas_call(
        _clip_encoder_kernel,
        out_shape=jax.ShapeDtypeStruct((BATCH, 1, HIDDEN), jnp.float32),
        grid=(BATCH,),                                            # images are independent
        in_specs=in_specs,
        out_specs=pl.BlockSpec((1, 1, HIDDEN), lambda b: (b, 0, 0)),
        compiler_params=pltpu.CompilerParams(
            dimension_semantics=("parallel",)),                   # both TCs on v7x
    )(
        patches, params["patch_w"], embed_add,
        params["pre_ln_g"], params["pre_ln_b"],
        params["ln1_g"], params["ln1_b"],
        params["qkv_w"], params["qkv_b"],
        params["o_w"], params["o_b"],
        params["ln2_g"], params["ln2_b"],
        params["fc1_w"], params["fc1_b"],
        params["fc2_w"], params["fc2_b"],
        params["post_ln_g"], params["post_ln_b"],
    )
    return pooled.reshape(BATCH, HIDDEN)


# ----------------------------- main -----------------------------
if __name__ == "__main__":
    key = jax.random.PRNGKey(0)
    k_param, k_input = jax.random.split(key)

    params = init_params(k_param)
    pixel_values = jax.random.normal(k_input, (BATCH, CHANNELS, IMG, IMG), jnp.float32)

    fwd = jax.jit(reference_encoder_forward)
    pooled = jax.block_until_ready(fwd(pixel_values, params))

    assert pooled.shape == (BATCH, HIDDEN), pooled.shape
    assert bool(jnp.all(jnp.isfinite(pooled)))
    print("KERNEL_OK")
</pallas_src>

<mosaic_0001>
module attributes {stable_mosaic.version = 11 : i64} {
  func.func @_clip_encoder_kernel(%arg0: i32, %arg1: memref<1x8x192xbf16, #tpu.memory_space<vmem>>, %arg2: memref<192x32xbf16, #tpu.memory_space<vmem>>, %arg3: memref<8x32xf32, #tpu.memory_space<vmem>>, %arg4: memref<1x32xf32, #tpu.memory_space<vmem>>, %arg5: memref<1x32xf32, #tpu.memory_space<vmem>>, %arg6: memref<2x1x32xf32, #tpu.memory_space<vmem>>, %arg7: memref<2x1x32xf32, #tpu.memory_space<vmem>>, %arg8: memref<2x32x96xbf16, #tpu.memory_space<vmem>>, %arg9: memref<2x1x96xf32, #tpu.memory_space<vmem>>, %arg10: memref<2x32x32xbf16, #tpu.memory_space<vmem>>, %arg11: memref<2x1x32xf32, #tpu.memory_space<vmem>>, %arg12: memref<2x1x32xf32, #tpu.memory_space<vmem>>, %arg13: memref<2x1x32xf32, #tpu.memory_space<vmem>>, %arg14: memref<2x32x64xbf16, #tpu.memory_space<vmem>>, %arg15: memref<2x1x64xf32, #tpu.memory_space<vmem>>, %arg16: memref<2x64x32xbf16, #tpu.memory_space<vmem>>, %arg17: memref<2x1x32xf32, #tpu.memory_space<vmem>>, %arg18: memref<1x32xf32, #tpu.memory_space<vmem>>, %arg19: memref<1x32xf32, #tpu.memory_space<vmem>>, %arg20: memref<1x1x32xf32, #tpu.memory_space<vmem>>) attributes {dimension_semantics = [#tpu.dimension_semantics<parallel>], iteration_bounds = array<i64: 2>, scalar_prefetch = 0 : i64, scratch_operands = 0 : i64, tpu.core_type = #tpu.core_type<tc>, window_params = [{transform_indices = @transform_0, window_bounds = array<i64: 1, 8, 192>}, {pipeline_mode = #tpu.pipeline_mode<synchronous>, transform_indices = @transform_1, window_bounds = array<i64: 192, 32>}, {pipeline_mode = #tpu.pipeline_mode<synchronous>, transform_indices = @transform_2, window_bounds = array<i64: 8, 32>}, {pipeline_mode = #tpu.pipeline_mode<synchronous>, transform_indices = @transform_3, window_bounds = array<i64: 1, 32>}, {pipeline_mode = #tpu.pipeline_mode<synchronous>, transform_indices = @transform_4, window_bounds = array<i64: 1, 32>}, {pipeline_mode = #tpu.pipeline_mode<synchronous>, transform_indices = @transform_5, window_bounds = array<i64: 2, 1, 32>}, {pipeline_mode = #tpu.pipeline_mode<synchronous>, transform_indices = @transform_6, window_bounds = array<i64: 2, 1, 32>}, {pipeline_mode = #tpu.pipeline_mode<synchronous>, transform_indices = @transform_7, window_bounds = array<i64: 2, 32, 96>}, {pipeline_mode = #tpu.pipeline_mode<synchronous>, transform_indices = @transform_8, window_bounds = array<i64: 2, 1, 96>}, {pipeline_mode = #tpu.pipeline_mode<synchronous>, transform_indices = @transform_9, window_bounds = array<i64: 2, 32, 32>}, {pipeline_mode = #tpu.pipeline_mode<synchronous>, transform_indices = @transform_10, window_bounds = array<i64: 2, 1, 32>}, {pipeline_mode = #tpu.pipeline_mode<synchronous>, transform_indices = @transform_11, window_bounds = array<i64: 2, 1, 32>}, {pipeline_mode = #tpu.pipeline_mode<synchronous>, transform_indices = @transform_12, window_bounds = array<i64: 2, 1, 32>}, {pipeline_mode = #tpu.pipeline_mode<synchronous>, transform_indices = @transform_13, window_bounds = array<i64: 2, 32, 64>}, {pipeline_mode = #tpu.pipeline_mode<synchronous>, transform_indices = @transform_14, window_bounds = array<i64: 2, 1, 64>}, {pipeline_mode = #tpu.pipeline_mode<synchronous>, transform_indices = @transform_15, window_bounds = array<i64: 2, 64, 32>}, {pipeline_mode = #tpu.pipeline_mode<synchronous>, transform_indices = @transform_16, window_bounds = array<i64: 2, 1, 32>}, {pipeline_mode = #tpu.pipeline_mode<synchronous>, transform_indices = @transform_17, window_bounds = array<i64: 1, 32>}, {pipeline_mode = #tpu.pipeline_mode<synchronous>, transform_indices = @transform_18, window_bounds = array<i64: 1, 32>}, {transform_indices = @transform_19, window_bounds = array<i64: 1, 1, 32>}]} {
    %c0 = arith.constant 0 : index
    %c0_0 = arith.constant 0 : index
    %c0_1 = arith.constant 0 : index
    %0 = vector.load %arg1[%c0, %c0_0, %c0_1] : memref<1x8x192xbf16, #tpu.memory_space<vmem>>, vector<1x8x192xbf16>
    %1 = vector.shape_cast %0 : vector<1x8x192xbf16> to vector<8x192xbf16>
    %c0_2 = arith.constant 0 : index
    %c0_3 = arith.constant 0 : index
    %2 = vector.load %arg2[%c0_2, %c0_3] : memref<192x32xbf16, #tpu.memory_space<vmem>>, vector<192x32xbf16>
    %cst = arith.constant dense<0.000000e+00> : vector<8x32xf32>
    %3 = tpu.matmul %1, %2, %cst {dimension_numbers = #tpu.dot_dimension_numbers<[1], [0], [0], [1], [0, 0, 1, 1], [], []>} : vector<8x192xbf16>, vector<192x32xbf16>, vector<8x32xf32> -> vector<8x32xf32>
    %c0_4 = arith.constant 0 : index
    %c0_5 = arith.constant 0 : index
    %4 = vector.load %arg3[%c0_4, %c0_5] : memref<8x32xf32, #tpu.memory_space<vmem>>, vector<8x32xf32>
    %5 = arith.addf %3, %4 : vector<8x32xf32>
    %c0_6 = arith.constant 0 : index
    %c0_7 = arith.constant 0 : index
    %6 = vector.load %arg4[%c0_6, %c0_7] : memref<1x32xf32, #tpu.memory_space<vmem>>, vector<1x32xf32>
    %c0_8 = arith.constant 0 : index
    %c0_9 = arith.constant 0 : index
    %7 = vector.load %arg5[%c0_8, %c0_9] : memref<1x32xf32, #tpu.memory_space<vmem>>, vector<1x32xf32>
    %cst_10 = arith.constant dense<0.000000e+00> : vector<8xf32>
    %8 = vector.multi_reduction <add>, %5, %cst_10 [1] : vector<8x32xf32> to vector<8xf32>
    %9 = vector.shape_cast %8 : vector<8xf32> to vector<8x1xf32>
    %cst_11 = arith.constant 3.200000e+01 : f32
    %10 = vector.broadcast %cst_11 : f32 to vector<8x1xf32>
    %11 = arith.divf %9, %10 : vector<8x1xf32>
    %12 = vector.broadcast %11 : vector<8x1xf32> to vector<8x32xf32>
    %13 = arith.subf %5, %12 : vector<8x32xf32>
    %14 = arith.mulf %13, %13 : vector<8x32xf32>
    %cst_12 = arith.constant dense<0.000000e+00> : vector<8xf32>
    %15 = vector.multi_reduction <add>, %14, %cst_12 [1] : vector<8x32xf32> to vector<8xf32>
    %16 = vector.shape_cast %15 : vector<8xf32> to vector<8x1xf32>
    %cst_13 = arith.constant 3.200000e+01 : f32
    %17 = vector.broadcast %cst_13 : f32 to vector<8x1xf32>
    %18 = arith.divf %16, %17 : vector<8x1xf32>
    %cst_14 = arith.constant 9.99999974E-6 : f32
    %19 = vector.broadcast %cst_14 : f32 to vector<8x1xf32>
    %20 = arith.addf %18, %19 : vector<8x1xf32>
    %21 = math.rsqrt %20 : vector<8x1xf32>
    %22 = vector.broadcast %21 : vector<8x1xf32> to vector<8x32xf32>
    %23 = arith.mulf %13, %22 : vector<8x32xf32>
    %24 = vector.broadcast %6 : vector<1x32xf32> to vector<8x32xf32>
    %25 = arith.mulf %23, %24 : vector<8x32xf32>
    %26 = vector.broadcast %7 : vector<1x32xf32> to vector<8x32xf32>
    %27 = arith.addf %25, %26 : vector<8x32xf32>
    %28 = tpu.iota {dimensions = array<i32: 1>} : vector<8x8xi32>
    %c5_i32 = arith.constant 5 : i32
    %29 = vector.broadcast %c5_i32 : i32 to vector<8x8xi32>
    %30 = arith.cmpi sge, %28, %29 : vector<8x8xi32>
    %cst_15 = arith.constant -1.000000e+30 : f32
    %cst_16 = arith.constant 0.000000e+00 : f32
    %31 = vector.broadcast %cst_15 : f32 to vector<8x8xf32>
    %32 = vector.broadcast %cst_16 : f32 to vector<8x8xf32>
    %33 = arith.select %30, %31, %32 : vector<8x8xi1>, vector<8x8xf32>
    %c0_17 = arith.constant 0 : index
    %c0_18 = arith.constant 0 : index
    %c0_19 = arith.constant 0 : index
    %34 = vector.load %arg6[%c0_17, %c0_18, %c0_19] : memref<2x1x32xf32, #tpu.memory_space<vmem>>, vector<1x1x32xf32>
    %35 = vector.shape_cast %34 : vector<1x1x32xf32> to vector<1x32xf32>
    %c0_20 = arith.constant 0 : index
    %c0_21 = arith.constant 0 : index
    %c0_22 = arith.constant 0 : index
    %36 = vector.load %arg7[%c0_20, %c0_21, %c0_22] : memref<2x1x32xf32, #tpu.memory_space<vmem>>, vector<1x1x32xf32>
    %37 = vector.shape_cast %36 : vector<1x1x32xf32> to vector<1x32xf32>
    %cst_23 = arith.constant dense<0.000000e+00> : vector<8xf32>
    %38 = vector.multi_reduction <add>, %27, %cst_23 [1] : vector<8x32xf32> to vector<8xf32>
    %39 = vector.shape_cast %38 : vector<8xf32> to vector<8x1xf32>
    %cst_24 = arith.constant 3.200000e+01 : f32
    %40 = vector.broadcast %cst_24 : f32 to vector<8x1xf32>
    %41 = arith.divf %39, %40 : vector<8x1xf32>
    %42 = vector.broadcast %41 : vector<8x1xf32> to vector<8x32xf32>
    %43 = arith.subf %27, %42 : vector<8x32xf32>
    %44 = arith.mulf %43, %43 : vector<8x32xf32>
    %cst_25 = arith.constant dense<0.000000e+00> : vector<8xf32>
    %45 = vector.multi_reduction <add>, %44, %cst_25 [1] : vector<8x32xf32> to vector<8xf32>
    %46 = vector.shape_cast %45 : vector<8xf32> to vector<8x1xf32>
    %cst_26 = arith.constant 3.200000e+01 : f32
    %47 = vector.broadcast %cst_26 : f32 to vector<8x1xf32>
    %48 = arith.divf %46, %47 : vector<8x1xf32>
    %cst_27 = arith.constant 9.99999974E-6 : f32
    %49 = vector.broadcast %cst_27 : f32 to vector<8x1xf32>
    %50 = arith.addf %48, %49 : vector<8x1xf32>
    %51 = math.rsqrt %50 : vector<8x1xf32>
    %52 = vector.broadcast %51 : vector<8x1xf32> to vector<8x32xf32>
    %53 = arith.mulf %43, %52 : vector<8x32xf32>
    %54 = vector.broadcast %35 : vector<1x32xf32> to vector<8x32xf32>
    %55 = arith.mulf %53, %54 : vector<8x32xf32>
    %56 = vector.broadcast %37 : vector<1x32xf32> to vector<8x32xf32>
    %57 = arith.addf %55, %56 : vector<8x32xf32>
    %58 = arith.truncf %57 : vector<8x32xf32> to vector<8x32xbf16>
    %c0_28 = arith.constant 0 : index
    %c0_29 = arith.constant 0 : index
    %c0_30 = arith.constant 0 : index
    %59 = vector.load %arg8[%c0_28, %c0_29, %c0_30] : memref<2x32x96xbf16, #tpu.memory_space<vmem>>, vector<1x32x96xbf16>
    %60 = vector.shape_cast %59 : vector<1x32x96xbf16> to vector<32x96xbf16>
    %cst_31 = arith.constant dense<0.000000e+00> : vector<8x96xf32>
    %61 = tpu.matmul %58, %60, %cst_31 {dimension_numbers = #tpu.dot_dimension_numbers<[1], [0], [0], [1], [0, 0, 1, 1], [], []>} : vector<8x32xbf16>, vector<32x96xbf16>, vector<8x96xf32> -> vector<8x96xf32>
    %c0_32 = arith.constant 0 : index
    %c0_33 = arith.constant 0 : index
    %c0_34 = arith.constant 0 : index
    %62 = vector.load %arg9[%c0_32, %c0_33, %c0_34] : memref<2x1x96xf32, #tpu.memory_space<vmem>>, vector<1x1x96xf32>
    %63 = vector.shape_cast %62 : vector<1x1x96xf32> to vector<1x96xf32>
    %64 = vector.broadcast %63 : vector<1x96xf32> to vector<8x96xf32>
    %65 = arith.addf %61, %64 : vector<8x96xf32>
    %66 = arith.truncf %65 : vector<8x96xf32> to vector<8x96xbf16>
    %67 = vector.extract_strided_slice %66 {offsets = [0, 0], sizes = [8, 8], strides = [1, 1]} : vector<8x96xbf16> to vector<8x8xbf16>
    %68 = vector.extract_strided_slice %66 {offsets = [0, 32], sizes = [8, 8], strides = [1, 1]} : vector<8x96xbf16> to vector<8x8xbf16>
    %69 = vector.extract_strided_slice %66 {offsets = [0, 64], sizes = [8, 8], strides = [1, 1]} : vector<8x96xbf16> to vector<8x8xbf16>
    %cst_35 = arith.constant dense<0.000000e+00> : vector<8x8xf32>
    %70 = tpu.matmul %67, %68, %cst_35 {dimension_numbers = #tpu.dot_dimension_numbers<[1], [1], [0], [0], [0, 0, 1, 0], [], []>} : vector<8x8xbf16>, vector<8x8xbf16>, vector<8x8xf32> -> vector<8x8xf32>
    %cst_36 = arith.constant 0.353553385 : f32
    %71 = vector.broadcast %cst_36 : f32 to vector<8x8xf32>
    %72 = arith.mulf %70, %71 : vector<8x8xf32>
    %73 = arith.addf %72, %33 : vector<8x8xf32>
    %cst_37 = arith.constant dense<0xFF800000> : vector<8xf32>
    %74 = vector.multi_reduction <maximumf>, %73, %cst_37 [1] : vector<8x8xf32> to vector<8xf32>
    %75 = vector.shape_cast %74 : vector<8xf32> to vector<8x1xf32>
    %76 = vector.broadcast %75 : vector<8x1xf32> to vector<8x8xf32>
    %77 = arith.subf %73, %76 : vector<8x8xf32>
    %78 = math.exp %77 : vector<8x8xf32>
    %cst_38 = arith.constant dense<0.000000e+00> : vector<8xf32>
    %79 = vector.multi_reduction <add>, %78, %cst_38 [1] : vector<8x8xf32> to vector<8xf32>
    %80 = vector.shape_cast %79 : vector<8xf32> to vector<8x1xf32>
    %81 = tpu.reciprocal %80 {approx = true} : vector<8x1xf32> -> vector<8x1xf32>
    %82 = vector.broadcast %81 : vector<8x1xf32> to vector<8x8xf32>
    %83 = arith.mulf %78, %82 : vector<8x8xf32>
    %84 = arith.truncf %83 : vector<8x8xf32> to vector<8x8xbf16>
    %cst_39 = arith.constant dense<0.000000e+00> : vector<8x8xf32>
    %85 = tpu.matmul %84, %69, %cst_39 {dimension_numbers = #tpu.dot_dimension_numbers<[1], [0], [0], [1], [0, 0, 1, 1], [], []>} : vector<8x8xbf16>, vector<8x8xbf16>, vector<8x8xf32> -> vector<8x8xf32>
    %86 = vector.extract_strided_slice %66 {offsets = [0, 8], sizes = [8, 8], strides = [1, 1]} : vector<8x96xbf16> to vector<8x8xbf16>
    %87 = vector.extract_strided_slice %66 {offsets = [0, 40], sizes = [8, 8], strides = [1, 1]} : vector<8x96xbf16> to vector<8x8xbf16>
    %88 = vector.extract_strided_slice %66 {offsets = [0, 72], sizes = [8, 8], strides = [1, 1]} : vector<8x96xbf16> to vector<8x8xbf16>
    %cst_40 = arith.constant dense<0.000000e+00> : vector<8x8xf32>
    %89 = tpu.matmul %86, %87, %cst_40 {dimension_numbers = #tpu.dot_dimension_numbers<[1], [1], [0], [0], [0, 0, 1, 0], [], []>} : vector<8x8xbf16>, vector<8x8xbf16>, vector<8x8xf32> -> vector<8x8xf32>
    %cst_41 = arith.constant 0.353553385 : f32
    %90 = vector.broadcast %cst_41 : f32 to vector<8x8xf32>
    %91 = arith.mulf %89, %90 : vector<8x8xf32>
    %92 = arith.addf %91, %33 : vector<8x8xf32>
    %cst_42 = arith.constant dense<0xFF800000> : vector<8xf32>
    %93 = vector.multi_reduction <maximumf>, %92, %cst_42 [1] : vector<8x8xf32> to vector<8xf32>
    %94 = vector.shape_cast %93 : vector<8xf32> to vector<8x1xf32>
    %95 = vector.broadcast %94 : vector<8x1xf32> to vector<8x8xf32>
    %96 = arith.subf %92, %95 : vector<8x8xf32>
    %97 = math.exp %96 : vector<8x8xf32>
    %cst_43 = arith.constant dense<0.000000e+00> : vector<8xf32>
    %98 = vector.multi_reduction <add>, %97, %cst_43 [1] : vector<8x8xf32> to vector<8xf32>
    %99 = vector.shape_cast %98 : vector<8xf32> to vector<8x1xf32>
    %100 = tpu.reciprocal %99 {approx = true} : vector<8x1xf32> -> vector<8x1xf32>
    %101 = vector.broadcast %100 : vector<8x1xf32> to vector<8x8xf32>
    %102 = arith.mulf %97, %101 : vector<8x8xf32>
    %103 = arith.truncf %102 : vector<8x8xf32> to vector<8x8xbf16>
    %cst_44 = arith.constant dense<0.000000e+00> : vector<8x8xf32>
    %104 = tpu.matmul %103, %88, %cst_44 {dimension_numbers = #tpu.dot_dimension_numbers<[1], [0], [0], [1], [0, 0, 1, 1], [], []>} : vector<8x8xbf16>, vector<8x8xbf16>, vector<8x8xf32> -> vector<8x8xf32>
    %105 = vector.extract_strided_slice %66 {offsets = [0, 16], sizes = [8, 8], strides = [1, 1]} : vector<8x96xbf16> to vector<8x8xbf16>
    %106 = vector.extract_strided_slice %66 {offsets = [0, 48], sizes = [8, 8], strides = [1, 1]} : vector<8x96xbf16> to vector<8x8xbf16>
    %107 = vector.extract_strided_slice %66 {offsets = [0, 80], sizes = [8, 8], strides = [1, 1]} : vector<8x96xbf16> to vector<8x8xbf16>
    %cst_45 = arith.constant dense<0.000000e+00> : vector<8x8xf32>
    %108 = tpu.matmul %105, %106, %cst_45 {dimension_numbers = #tpu.dot_dimension_numbers<[1], [1], [0], [0], [0, 0, 1, 0], [], []>} : vector<8x8xbf16>, vector<8x8xbf16>, vector<8x8xf32> -> vector<8x8xf32>
    %cst_46 = arith.constant 0.353553385 : f32
    %109 = vector.broadcast %cst_46 : f32 to vector<8x8xf32>
    %110 = arith.mulf %108, %109 : vector<8x8xf32>
    %111 = arith.addf %110, %33 : vector<8x8xf32>
    %cst_47 = arith.constant dense<0xFF800000> : vector<8xf32>
    %112 = vector.multi_reduction <maximumf>, %111, %cst_47 [1] : vector<8x8xf32> to vector<8xf32>
    %113 = vector.shape_cast %112 : vector<8xf32> to vector<8x1xf32>
    %114 = vector.broadcast %113 : vector<8x1xf32> to vector<8x8xf32>
    %115 = arith.subf %111, %114 : vector<8x8xf32>
    %116 = math.exp %115 : vector<8x8xf32>
    %cst_48 = arith.constant dense<0.000000e+00> : vector<8xf32>
    %117 = vector.multi_reduction <add>, %116, %cst_48 [1] : vector<8x8xf32> to vector<8xf32>
    %118 = vector.shape_cast %117 : vector<8xf32> to vector<8x1xf32>
    %119 = tpu.reciprocal %118 {approx = true} : vector<8x1xf32> -> vector<8x1xf32>
    %120 = vector.broadcast %119 : vector<8x1xf32> to vector<8x8xf32>
    %121 = arith.mulf %116, %120 : vector<8x8xf32>
    %122 = arith.truncf %121 : vector<8x8xf32> to vector<8x8xbf16>
    %cst_49 = arith.constant dense<0.000000e+00> : vector<8x8xf32>
    %123 = tpu.matmul %122, %107, %cst_49 {dimension_numbers = #tpu.dot_dimension_numbers<[1], [0], [0], [1], [0, 0, 1, 1], [], []>} : vector<8x8xbf16>, vector<8x8xbf16>, vector<8x8xf32> -> vector<8x8xf32>
    %124 = vector.extract_strided_slice %66 {offsets = [0, 24], sizes = [8, 8], strides = [1, 1]} : vector<8x96xbf16> to vector<8x8xbf16>
    %125 = vector.extract_strided_slice %66 {offsets = [0, 56], sizes = [8, 8], strides = [1, 1]} : vector<8x96xbf16> to vector<8x8xbf16>
    %126 = vector.extract_strided_slice %66 {offsets = [0, 88], sizes = [8, 8], strides = [1, 1]} : vector<8x96xbf16> to vector<8x8xbf16>
    %cst_50 = arith.constant dense<0.000000e+00> : vector<8x8xf32>
    %127 = tpu.matmul %124, %125, %cst_50 {dimension_numbers = #tpu.dot_dimension_numbers<[1], [1], [0], [0], [0, 0, 1, 0], [], []>} : vector<8x8xbf16>, vector<8x8xbf16>, vector<8x8xf32> -> vector<8x8xf32>
    %cst_51 = arith.constant 0.353553385 : f32
    %128 = vector.broadcast %cst_51 : f32 to vector<8x8xf32>
    %129 = arith.mulf %127, %128 : vector<8x8xf32>
    %130 = arith.addf %129, %33 : vector<8x8xf32>
    %cst_52 = arith.constant dense<0xFF800000> : vector<8xf32>
    %131 = vector.multi_reduction <maximumf>, %130, %cst_52 [1] : vector<8x8xf32> to vector<8xf32>
    %132 = vector.shape_cast %131 : vector<8xf32> to vector<8x1xf32>
    %133 = vector.broadcast %132 : vector<8x1xf32> to vector<8x8xf32>
    %134 = arith.subf %130, %133 : vector<8x8xf32>
    %135 = math.exp %134 : vector<8x8xf32>
    %cst_53 = arith.constant dense<0.000000e+00> : vector<8xf32>
    %136 = vector.multi_reduction <add>, %135, %cst_53 [1] : vector<8x8xf32> to vector<8xf32>
    %137 = vector.shape_cast %136 : vector<8xf32> to vector<8x1xf32>
    %138 = tpu.reciprocal %137 {approx = true} : vector<8x1xf32> -> vector<8x1xf32>
    %139 = vector.broadcast %138 : vector<8x1xf32> to vector<8x8xf32>
    %140 = arith.mulf %135, %139 : vector<8x8xf32>
    %141 = arith.truncf %140 : vector<8x8xf32> to vector<8x8xbf16>
    %cst_54 = arith.constant dense<0.000000e+00> : vector<8x8xf32>
    %142 = tpu.matmul %141, %126, %cst_54 {dimension_numbers = #tpu.dot_dimension_numbers<[1], [0], [0], [1], [0, 0, 1, 1], [], []>} : vector<8x8xbf16>, vector<8x8xbf16>, vector<8x8xf32> -> vector<8x8xf32>
    %143 = tpu.concatenate %85, %104, %123, %142 in 1 : vector<8x8xf32>, vector<8x8xf32>, vector<8x8xf32>, vector<8x8xf32> -> vector<8x32xf32>
    %144 = arith.truncf %143 : vector<8x32xf32> to vector<8x32xbf16>
    %c0_55 = arith.constant 0 : index
    %c0_56 = arith.constant 0 : index
    %c0_57 = arith.constant 0 : index
    %145 = vector.load %arg10[%c0_55, %c0_56, %c0_57] : memref<2x32x32xbf16, #tpu.memory_space<vmem>>, vector<1x32x32xbf16>
    %146 = vector.shape_cast %145 : vector<1x32x32xbf16> to vector<32x32xbf16>
    %cst_58 = arith.constant dense<0.000000e+00> : vector<8x32xf32>
    %147 = tpu.matmul %144, %146, %cst_58 {dimension_numbers = #tpu.dot_dimension_numbers<[1], [0], [0], [1], [0, 0, 1, 1], [], []>} : vector<8x32xbf16>, vector<32x32xbf16>, vector<8x32xf32> -> vector<8x32xf32>
    %c0_59 = arith.constant 0 : index
    %c0_60 = arith.constant 0 : index
    %c0_61 = arith.constant 0 : index
    %148 = vector.load %arg11[%c0_59, %c0_60, %c0_61] : memref<2x1x32xf32, #tpu.memory_space<vmem>>, vector<1x1x32xf32>
    %149 = vector.shape_cast %148 : vector<1x1x32xf32> to vector<1x32xf32>
    %150 = vector.broadcast %149 : vector<1x32xf32> to vector<8x32xf32>
    %151 = arith.addf %147, %150 : vector<8x32xf32>
    %152 = arith.addf %27, %151 : vector<8x32xf32>
    %c0_62 = arith.constant 0 : index
    %c0_63 = arith.constant 0 : index
    %c0_64 = arith.constant 0 : index
    %153 = vector.load %arg12[%c0_62, %c0_63, %c0_64] : memref<2x1x32xf32, #tpu.memory_space<vmem>>, vector<1x1x32xf32>
    %154 = vector.shape_cast %153 : vector<1x1x32xf32> to vector<1x32xf32>
    %c0_65 = arith.constant 0 : index
    %c0_66 = arith.constant 0 : index
    %c0_67 = arith.constant 0 : index
    %155 = vector.load %arg13[%c0_65, %c0_66, %c0_67] : memref<2x1x32xf32, #tpu.memory_space<vmem>>, vector<1x1x32xf32>
    %156 = vector.shape_cast %155 : vector<1x1x32xf32> to vector<1x32xf32>
    %cst_68 = arith.constant dense<0.000000e+00> : vector<8xf32>
    %157 = vector.multi_reduction <add>, %152, %cst_68 [1] : vector<8x32xf32> to vector<8xf32>
    %158 = vector.shape_cast %157 : vector<8xf32> to vector<8x1xf32>
    %cst_69 = arith.constant 3.200000e+01 : f32
    %159 = vector.broadcast %cst_69 : f32 to vector<8x1xf32>
    %160 = arith.divf %158, %159 : vector<8x1xf32>
    %161 = vector.broadcast %160 : vector<8x1xf32> to vector<8x32xf32>
    %162 = arith.subf %152, %161 : vector<8x32xf32>
    %163 = arith.mulf %162, %162 : vector<8x32xf32>
    %cst_70 = arith.constant dense<0.000000e+00> : vector<8xf32>
    %164 = vector.multi_reduction <add>, %163, %cst_70 [1] : vector<8x32xf32> to vector<8xf32>
    %165 = vector.shape_cast %164 : vector<8xf32> to vector<8x1xf32>
    %cst_71 = arith.constant 3.200000e+01 : f32
    %166 = vector.broadcast %cst_71 : f32 to vector<8x1xf32>
    %167 = arith.divf %165, %166 : vector<8x1xf32>
    %cst_72 = arith.constant 9.99999974E-6 : f32
    %168 = vector.broadcast %cst_72 : f32 to vector<8x1xf32>
    %169 = arith.addf %167, %168 : vector<8x1xf32>
    %170 = math.rsqrt %169 : vector<8x1xf32>
    %171 = vector.broadcast %170 : vector<8x1xf32> to vector<8x32xf32>
    %172 = arith.mulf %162, %171 : vector<8x32xf32>
    %173 = vector.broadcast %154 : vector<1x32xf32> to vector<8x32xf32>
    %174 = arith.mulf %172, %173 : vector<8x32xf32>
    %175 = vector.broadcast %156 : vector<1x32xf32> to vector<8x32xf32>
    %176 = arith.addf %174, %175 : vector<8x32xf32>
    %177 = arith.truncf %176 : vector<8x32xf32> to vector<8x32xbf16>
    %c0_73 = arith.constant 0 : index
    %c0_74 = arith.constant 0 : index
    %c0_75 = arith.constant 0 : index
    %178 = vector.load %arg14[%c0_73, %c0_74, %c0_75] : memref<2x32x64xbf16, #tpu.memory_space<vmem>>, vector<1x32x64xbf16>
    %179 = vector.shape_cast %178 : vector<1x32x64xbf16> to vector<32x64xbf16>
    %cst_76 = arith.constant dense<0.000000e+00> : vector<8x64xf32>
    %180 = tpu.matmul %177, %179, %cst_76 {dimension_numbers = #tpu.dot_dimension_numbers<[1], [0], [0], [1], [0, 0, 1, 1], [], []>} : vector<8x32xbf16>, vector<32x64xbf16>, vector<8x64xf32> -> vector<8x64xf32>
    %c0_77 = arith.constant 0 : index
    %c0_78 = arith.constant 0 : index
    %c0_79 = arith.constant 0 : index
    %181 = vector.load %arg15[%c0_77, %c0_78, %c0_79] : memref<2x1x64xf32, #tpu.memory_space<vmem>>, vector<1x1x64xf32>
    %182 = vector.shape_cast %181 : vector<1x1x64xf32> to vector<1x64xf32>
    %183 = vector.broadcast %182 : vector<1x64xf32> to vector<8x64xf32>
    %184 = arith.addf %180, %183 : vector<8x64xf32>
    %cst_80 = arith.constant 1.702000e+00 : f32
    %185 = vector.broadcast %cst_80 : f32 to vector<8x64xf32>
    %186 = arith.mulf %185, %184 : vector<8x64xf32>
    %187 = arith.negf %186 : vector<8x64xf32>
    %188 = math.exp %187 : vector<8x64xf32>
    %cst_81 = arith.constant 1.000000e+00 : f32
    %189 = vector.broadcast %cst_81 : f32 to vector<8x64xf32>
    %190 = arith.addf %189, %188 : vector<8x64xf32>
    %191 = arith.divf %189, %190 : vector<8x64xf32>
    %192 = arith.mulf %184, %191 : vector<8x64xf32>
    %193 = arith.truncf %192 : vector<8x64xf32> to vector<8x64xbf16>
    %c0_82 = arith.constant 0 : index
    %c0_83 = arith.constant 0 : index
    %c0_84 = arith.constant 0 : index
    %194 = vector.load %arg16[%c0_82, %c0_83, %c0_84] : memref<2x64x32xbf16, #tpu.memory_space<vmem>>, vector<1x64x32xbf16>
    %195 = vector.shape_cast %194 : vector<1x64x32xbf16> to vector<64x32xbf16>
    %cst_85 = arith.constant dense<0.000000e+00> : vector<8x32xf32>
    %196 = tpu.matmul %193, %195, %cst_85 {dimension_numbers = #tpu.dot_dimension_numbers<[1], [0], [0], [1], [0, 0, 1, 1], [], []>} : vector<8x64xbf16>, vector<64x32xbf16>, vector<8x32xf32> -> vector<8x32xf32>
    %197 = arith.addf %152, %196 : vector<8x32xf32>
    %c0_86 = arith.constant 0 : index
    %c0_87 = arith.constant 0 : index
    %c0_88 = arith.constant 0 : index
    %198 = vector.load %arg17[%c0_86, %c0_87, %c0_88] : memref<2x1x32xf32, #tpu.memory_space<vmem>>, vector<1x1x32xf32>
    %199 = vector.shape_cast %198 : vector<1x1x32xf32> to vector<1x32xf32>
    %200 = vector.broadcast %199 : vector<1x32xf32> to vector<8x32xf32>
    %201 = arith.addf %197, %200 : vector<8x32xf32>
    %c1 = arith.constant 1 : index
    %c0_89 = arith.constant 0 : index
    %c0_90 = arith.constant 0 : index
    %202 = vector.load %arg6[%c1, %c0_89, %c0_90] : memref<2x1x32xf32, #tpu.memory_space<vmem>>, vector<1x1x32xf32>
    %203 = vector.shape_cast %202 : vector<1x1x32xf32> to vector<1x32xf32>
    %c1_91 = arith.constant 1 : index
    %c0_92 = arith.constant 0 : index
    %c0_93 = arith.constant 0 : index
    %204 = vector.load %arg7[%c1_91, %c0_92, %c0_93] : memref<2x1x32xf32, #tpu.memory_space<vmem>>, vector<1x1x32xf32>
    %205 = vector.shape_cast %204 : vector<1x1x32xf32> to vector<1x32xf32>
    %cst_94 = arith.constant dense<0.000000e+00> : vector<8xf32>
    %206 = vector.multi_reduction <add>, %201, %cst_94 [1] : vector<8x32xf32> to vector<8xf32>
    %207 = vector.shape_cast %206 : vector<8xf32> to vector<8x1xf32>
    %cst_95 = arith.constant 3.200000e+01 : f32
    %208 = vector.broadcast %cst_95 : f32 to vector<8x1xf32>
    %209 = arith.divf %207, %208 : vector<8x1xf32>
    %210 = vector.broadcast %209 : vector<8x1xf32> to vector<8x32xf32>
    %211 = arith.subf %201, %210 : vector<8x32xf32>
    %212 = arith.mulf %211, %211 : vector<8x32xf32>
    %cst_96 = arith.constant dense<0.000000e+00> : vector<8xf32>
    %213 = vector.multi_reduction <add>, %212, %cst_96 [1] : vector<8x32xf32> to vector<8xf32>
    %214 = vector.shape_cast %213 : vector<8xf32> to vector<8x1xf32>
    %cst_97 = arith.constant 3.200000e+01 : f32
    %215 = vector.broadcast %cst_97 : f32 to vector<8x1xf32>
    %216 = arith.divf %214, %215 : vector<8x1xf32>
    %cst_98 = arith.constant 9.99999974E-6 : f32
    %217 = vector.broadcast %cst_98 : f32 to vector<8x1xf32>
    %218 = arith.addf %216, %217 : vector<8x1xf32>
    %219 = math.rsqrt %218 : vector<8x1xf32>
    %220 = vector.broadcast %219 : vector<8x1xf32> to vector<8x32xf32>
    %221 = arith.mulf %211, %220 : vector<8x32xf32>
    %222 = vector.broadcast %203 : vector<1x32xf32> to vector<8x32xf32>
    %223 = arith.mulf %221, %222 : vector<8x32xf32>
    %224 = vector.broadcast %205 : vector<1x32xf32> to vector<8x32xf32>
    %225 = arith.addf %223, %224 : vector<8x32xf32>
    %226 = arith.truncf %225 : vector<8x32xf32> to vector<8x32xbf16>
    %c1_99 = arith.constant 1 : index
    %c0_100 = arith.constant 0 : index
    %c0_101 = arith.constant 0 : index
    %227 = vector.load %arg8[%c1_99, %c0_100, %c0_101] : memref<2x32x96xbf16, #tpu.memory_space<vmem>>, vector<1x32x96xbf16>
    %228 = vector.shape_cast %227 : vector<1x32x96xbf16> to vector<32x96xbf16>
    %cst_102 = arith.constant dense<0.000000e+00> : vector<8x96xf32>
    %229 = tpu.matmul %226, %228, %cst_102 {dimension_numbers = #tpu.dot_dimension_numbers<[1], [0], [0], [1], [0, 0, 1, 1], [], []>} : vector<8x32xbf16>, vector<32x96xbf16>, vector<8x96xf32> -> vector<8x96xf32>
    %c1_103 = arith.constant 1 : index
    %c0_104 = arith.constant 0 : index
    %c0_105 = arith.constant 0 : index
    %230 = vector.load %arg9[%c1_103, %c0_104, %c0_105] : memref<2x1x96xf32, #tpu.memory_space<vmem>>, vector<1x1x96xf32>
    %231 = vector.shape_cast %230 : vector<1x1x96xf32> to vector<1x96xf32>
    %232 = vector.broadcast %231 : vector<1x96xf32> to vector<8x96xf32>
    %233 = arith.addf %229, %232 : vector<8x96xf32>
    %234 = arith.truncf %233 : vector<8x96xf32> to vector<8x96xbf16>
    %235 = vector.extract_strided_slice %234 {offsets = [0, 0], sizes = [8, 8], strides = [1, 1]} : vector<8x96xbf16> to vector<8x8xbf16>
    %236 = vector.extract_strided_slice %234 {offsets = [0, 32], sizes = [8, 8], strides = [1, 1]} : vector<8x96xbf16> to vector<8x8xbf16>
    %237 = vector.extract_strided_slice %234 {offsets = [0, 64], sizes = [8, 8], strides = [1, 1]} : vector<8x96xbf16> to vector<8x8xbf16>
    %cst_106 = arith.constant dense<0.000000e+00> : vector<8x8xf32>
    %238 = tpu.matmul %235, %236, %cst_106 {dimension_numbers = #tpu.dot_dimension_numbers<[1], [1], [0], [0], [0, 0, 1, 0], [], []>} : vector<8x8xbf16>, vector<8x8xbf16>, vector<8x8xf32> -> vector<8x8xf32>
    %cst_107 = arith.constant 0.353553385 : f32
    %239 = vector.broadcast %cst_107 : f32 to vector<8x8xf32>
    %240 = arith.mulf %238, %239 : vector<8x8xf32>
    %241 = arith.addf %240, %33 : vector<8x8xf32>
    %cst_108 = arith.constant dense<0xFF800000> : vector<8xf32>
    %242 = vector.multi_reduction <maximumf>, %241, %cst_108 [1] : vector<8x8xf32> to vector<8xf32>
    %243 = vector.shape_cast %242 : vector<8xf32> to vector<8x1xf32>
    %244 = vector.broadcast %243 : vector<8x1xf32> to vector<8x8xf32>
    %245 = arith.subf %241, %244 : vector<8x8xf32>
    %246 = math.exp %245 : vector<8x8xf32>
    %cst_109 = arith.constant dense<0.000000e+00> : vector<8xf32>
    %247 = vector.multi_reduction <add>, %246, %cst_109 [1] : vector<8x8xf32> to vector<8xf32>
    %248 = vector.shape_cast %247 : vector<8xf32> to vector<8x1xf32>
    %249 = tpu.reciprocal %248 {approx = true} : vector<8x1xf32> -> vector<8x1xf32>
    %250 = vector.broadcast %249 : vector<8x1xf32> to vector<8x8xf32>
    %251 = arith.mulf %246, %250 : vector<8x8xf32>
    %252 = arith.truncf %251 : vector<8x8xf32> to vector<8x8xbf16>
    %cst_110 = arith.constant dense<0.000000e+00> : vector<8x8xf32>
    %253 = tpu.matmul %252, %237, %cst_110 {dimension_numbers = #tpu.dot_dimension_numbers<[1], [0], [0], [1], [0, 0, 1, 1], [], []>} : vector<8x8xbf16>, vector<8x8xbf16>, vector<8x8xf32> -> vector<8x8xf32>
    %254 = vector.extract_strided_slice %234 {offsets = [0, 8], sizes = [8, 8], strides = [1, 1]} : vector<8x96xbf16> to vector<8x8xbf16>
    %255 = vector.extract_strided_slice %234 {offsets = [0, 40], sizes = [8, 8], strides = [1, 1]} : vector<8x96xbf16> to vector<8x8xbf16>
    %256 = vector.extract_strided_slice %234 {offsets = [0, 72], sizes = [8, 8], strides = [1, 1]} : vector<8x96xbf16> to vector<8x8xbf16>
    %cst_111 = arith.constant dense<0.000000e+00> : vector<8x8xf32>
    %257 = tpu.matmul %254, %255, %cst_111 {dimension_numbers = #tpu.dot_dimension_numbers<[1], [1], [0], [0], [0, 0, 1, 0], [], []>} : vector<8x8xbf16>, vector<8x8xbf16>, vector<8x8xf32> -> vector<8x8xf32>
    %cst_112 = arith.constant 0.353553385 : f32
    %258 = vector.broadcast %cst_112 : f32 to vector<8x8xf32>
    %259 = arith.mulf %257, %258 : vector<8x8xf32>
    %260 = arith.addf %259, %33 : vector<8x8xf32>
    %cst_113 = arith.constant dense<0xFF800000> : vector<8xf32>
    %261 = vector.multi_reduction <maximumf>, %260, %cst_113 [1] : vector<8x8xf32> to vector<8xf32>
    %262 = vector.shape_cast %261 : vector<8xf32> to vector<8x1xf32>
    %263 = vector.broadcast %262 : vector<8x1xf32> to vector<8x8xf32>
    %264 = arith.subf %260, %263 : vector<8x8xf32>
    %265 = math.exp %264 : vector<8x8xf32>
    %cst_114 = arith.constant dense<0.000000e+00> : vector<8xf32>
    %266 = vector.multi_reduction <add>, %265, %cst_114 [1] : vector<8x8xf32> to vector<8xf32>
    %267 = vector.shape_cast %266 : vector<8xf32> to vector<8x1xf32>
    %268 = tpu.reciprocal %267 {approx = true} : vector<8x1xf32> -> vector<8x1xf32>
    %269 = vector.broadcast %268 : vector<8x1xf32> to vector<8x8xf32>
    %270 = arith.mulf %265, %269 : vector<8x8xf32>
    %271 = arith.truncf %270 : vector<8x8xf32> to vector<8x8xbf16>
    %cst_115 = arith.constant dense<0.000000e+00> : vector<8x8xf32>
    %272 = tpu.matmul %271, %256, %cst_115 {dimension_numbers = #tpu.dot_dimension_numbers<[1], [0], [0], [1], [0, 0, 1, 1], [], []>} : vector<8x8xbf16>, vector<8x8xbf16>, vector<8x8xf32> -> vector<8x8xf32>
    %273 = vector.extract_strided_slice %234 {offsets = [0, 16], sizes = [8, 8], strides = [1, 1]} : vector<8x96xbf16> to vector<8x8xbf16>
    %274 = vector.extract_strided_slice %234 {offsets = [0, 48], sizes = [8, 8], strides = [1, 1]} : vector<8x96xbf16> to vector<8x8xbf16>
    %275 = vector.extract_strided_slice %234 {offsets = [0, 80], sizes = [8, 8], strides = [1, 1]} : vector<8x96xbf16> to vector<8x8xbf16>
    %cst_116 = arith.constant dense<0.000000e+00> : vector<8x8xf32>
    %276 = tpu.matmul %273, %274, %cst_116 {dimension_numbers = #tpu.dot_dimension_numbers<[1], [1], [0], [0], [0, 0, 1, 0], [], []>} : vector<8x8xbf16>, vector<8x8xbf16>, vector<8x8xf32> -> vector<8x8xf32>
    %cst_117 = arith.constant 0.353553385 : f32
    %277 = vector.broadcast %cst_117 : f32 to vector<8x8xf32>
    %278 = arith.mulf %276, %277 : vector<8x8xf32>
    %279 = arith.addf %278, %33 : vector<8x8xf32>
    %cst_118 = arith.constant dense<0xFF800000> : vector<8xf32>
    %280 = vector.multi_reduction <maximumf>, %279, %cst_118 [1] : vector<8x8xf32> to vector<8xf32>
    %281 = vector.shape_cast %280 : vector<8xf32> to vector<8x1xf32>
    %282 = vector.broadcast %281 : vector<8x1xf32> to vector<8x8xf32>
    %283 = arith.subf %279, %282 : vector<8x8xf32>
    %284 = math.exp %283 : vector<8x8xf32>
    %cst_119 = arith.constant dense<0.000000e+00> : vector<8xf32>
    %285 = vector.multi_reduction <add>, %284, %cst_119 [1] : vector<8x8xf32> to vector<8xf32>
    %286 = vector.shape_cast %285 : vector<8xf32> to vector<8x1xf32>
    %287 = tpu.reciprocal %286 {approx = true} : vector<8x1xf32> -> vector<8x1xf32>
    %288 = vector.broadcast %287 : vector<8x1xf32> to vector<8x8xf32>
    %289 = arith.mulf %284, %288 : vector<8x8xf32>
    %290 = arith.truncf %289 : vector<8x8xf32> to vector<8x8xbf16>
    %cst_120 = arith.constant dense<0.000000e+00> : vector<8x8xf32>
    %291 = tpu.matmul %290, %275, %cst_120 {dimension_numbers = #tpu.dot_dimension_numbers<[1], [0], [0], [1], [0, 0, 1, 1], [], []>} : vector<8x8xbf16>, vector<8x8xbf16>, vector<8x8xf32> -> vector<8x8xf32>
    %292 = vector.extract_strided_slice %234 {offsets = [0, 24], sizes = [8, 8], strides = [1, 1]} : vector<8x96xbf16> to vector<8x8xbf16>
    %293 = vector.extract_strided_slice %234 {offsets = [0, 56], sizes = [8, 8], strides = [1, 1]} : vector<8x96xbf16> to vector<8x8xbf16>
    %294 = vector.extract_strided_slice %234 {offsets = [0, 88], sizes = [8, 8], strides = [1, 1]} : vector<8x96xbf16> to vector<8x8xbf16>
    %cst_121 = arith.constant dense<0.000000e+00> : vector<8x8xf32>
    %295 = tpu.matmul %292, %293, %cst_121 {dimension_numbers = #tpu.dot_dimension_numbers<[1], [1], [0], [0], [0, 0, 1, 0], [], []>} : vector<8x8xbf16>, vector<8x8xbf16>, vector<8x8xf32> -> vector<8x8xf32>
    %cst_122 = arith.constant 0.353553385 : f32
    %296 = vector.broadcast %cst_122 : f32 to vector<8x8xf32>
    %297 = arith.mulf %295, %296 : vector<8x8xf32>
    %298 = arith.addf %297, %33 : vector<8x8xf32>
    %cst_123 = arith.constant dense<0xFF800000> : vector<8xf32>
    %299 = vector.multi_reduction <maximumf>, %298, %cst_123 [1] : vector<8x8xf32> to vector<8xf32>
    %300 = vector.shape_cast %299 : vector<8xf32> to vector<8x1xf32>
    %301 = vector.broadcast %300 : vector<8x1xf32> to vector<8x8xf32>
    %302 = arith.subf %298, %301 : vector<8x8xf32>
    %303 = math.exp %302 : vector<8x8xf32>
    %cst_124 = arith.constant dense<0.000000e+00> : vector<8xf32>
    %304 = vector.multi_reduction <add>, %303, %cst_124 [1] : vector<8x8xf32> to vector<8xf32>
    %305 = vector.shape_cast %304 : vector<8xf32> to vector<8x1xf32>
    %306 = tpu.reciprocal %305 {approx = true} : vector<8x1xf32> -> vector<8x1xf32>
    %307 = vector.broadcast %306 : vector<8x1xf32> to vector<8x8xf32>
    %308 = arith.mulf %303, %307 : vector<8x8xf32>
    %309 = arith.truncf %308 : vector<8x8xf32> to vector<8x8xbf16>
    %cst_125 = arith.constant dense<0.000000e+00> : vector<8x8xf32>
    %310 = tpu.matmul %309, %294, %cst_125 {dimension_numbers = #tpu.dot_dimension_numbers<[1], [0], [0], [1], [0, 0, 1, 1], [], []>} : vector<8x8xbf16>, vector<8x8xbf16>, vector<8x8xf32> -> vector<8x8xf32>
    %311 = tpu.concatenate %253, %272, %291, %310 in 1 : vector<8x8xf32>, vector<8x8xf32>, vector<8x8xf32>, vector<8x8xf32> -> vector<8x32xf32>
    %312 = arith.truncf %311 : vector<8x32xf32> to vector<8x32xbf16>
    %c1_126 = arith.constant 1 : index
    %c0_127 = arith.constant 0 : index
    %c0_128 = arith.constant 0 : index
    %313 = vector.load %arg10[%c1_126, %c0_127, %c0_128] : memref<2x32x32xbf16, #tpu.memory_space<vmem>>, vector<1x32x32xbf16>
    %314 = vector.shape_cast %313 : vector<1x32x32xbf16> to vector<32x32xbf16>
    %cst_129 = arith.constant dense<0.000000e+00> : vector<8x32xf32>
    %315 = tpu.matmul %312, %314, %cst_129 {dimension_numbers = #tpu.dot_dimension_numbers<[1], [0], [0], [1], [0, 0, 1, 1], [], []>} : vector<8x32xbf16>, vector<32x32xbf16>, vector<8x32xf32> -> vector<8x32xf32>
    %c1_130 = arith.constant 1 : index
    %c0_131 = arith.constant 0 : index
    %c0_132 = arith.constant 0 : index
    %316 = vector.load %arg11[%c1_130, %c0_131, %c0_132] : memref<2x1x32xf32, #tpu.memory_space<vmem>>, vector<1x1x32xf32>
    %317 = vector.shape_cast %316 : vector<1x1x32xf32> to vector<1x32xf32>
    %318 = vector.broadcast %317 : vector<1x32xf32> to vector<8x32xf32>
    %319 = arith.addf %315, %318 : vector<8x32xf32>
    %320 = arith.addf %201, %319 : vector<8x32xf32>
    %c1_133 = arith.constant 1 : index
    %c0_134 = arith.constant 0 : index
    %c0_135 = arith.constant 0 : index
    %321 = vector.load %arg12[%c1_133, %c0_134, %c0_135] : memref<2x1x32xf32, #tpu.memory_space<vmem>>, vector<1x1x32xf32>
    %322 = vector.shape_cast %321 : vector<1x1x32xf32> to vector<1x32xf32>
    %c1_136 = arith.constant 1 : index
    %c0_137 = arith.constant 0 : index
    %c0_138 = arith.constant 0 : index
    %323 = vector.load %arg13[%c1_136, %c0_137, %c0_138] : memref<2x1x32xf32, #tpu.memory_space<vmem>>, vector<1x1x32xf32>
    %324 = vector.shape_cast %323 : vector<1x1x32xf32> to vector<1x32xf32>
    %cst_139 = arith.constant dense<0.000000e+00> : vector<8xf32>
    %325 = vector.multi_reduction <add>, %320, %cst_139 [1] : vector<8x32xf32> to vector<8xf32>
    %326 = vector.shape_cast %325 : vector<8xf32> to vector<8x1xf32>
    %cst_140 = arith.constant 3.200000e+01 : f32
    %327 = vector.broadcast %cst_140 : f32 to vector<8x1xf32>
    %328 = arith.divf %326, %327 : vector<8x1xf32>
    %329 = vector.broadcast %328 : vector<8x1xf32> to vector<8x32xf32>
    %330 = arith.subf %320, %329 : vector<8x32xf32>
    %331 = arith.mulf %330, %330 : vector<8x32xf32>
    %cst_141 = arith.constant dense<0.000000e+00> : vector<8xf32>
    %332 = vector.multi_reduction <add>, %331, %cst_141 [1] : vector<8x32xf32> to vector<8xf32>
    %333 = vector.shape_cast %332 : vector<8xf32> to vector<8x1xf32>
    %cst_142 = arith.constant 3.200000e+01 : f32
    %334 = vector.broadcast %cst_142 : f32 to vector<8x1xf32>
    %335 = arith.divf %333, %334 : vector<8x1xf32>
    %cst_143 = arith.constant 9.99999974E-6 : f32
    %336 = vector.broadcast %cst_143 : f32 to vector<8x1xf32>
    %337 = arith.addf %335, %336 : vector<8x1xf32>
    %338 = math.rsqrt %337 : vector<8x1xf32>
    %339 = vector.broadcast %338 : vector<8x1xf32> to vector<8x32xf32>
    %340 = arith.mulf %330, %339 : vector<8x32xf32>
    %341 = vector.broadcast %322 : vector<1x32xf32> to vector<8x32xf32>
    %342 = arith.mulf %340, %341 : vector<8x32xf32>
    %343 = vector.broadcast %324 : vector<1x32xf32> to vector<8x32xf32>
    %344 = arith.addf %342, %343 : vector<8x32xf32>
    %345 = arith.truncf %344 : vector<8x32xf32> to vector<8x32xbf16>
    %c1_144 = arith.constant 1 : index
    %c0_145 = arith.constant 0 : index
    %c0_146 = arith.constant 0 : index
    %346 = vector.load %arg14[%c1_144, %c0_145, %c0_146] : memref<2x32x64xbf16, #tpu.memory_space<vmem>>, vector<1x32x64xbf16>
    %347 = vector.shape_cast %346 : vector<1x32x64xbf16> to vector<32x64xbf16>
    %cst_147 = arith.constant dense<0.000000e+00> : vector<8x64xf32>
    %348 = tpu.matmul %345, %347, %cst_147 {dimension_numbers = #tpu.dot_dimension_numbers<[1], [0], [0], [1], [0, 0, 1, 1], [], []>} : vector<8x32xbf16>, vector<32x64xbf16>, vector<8x64xf32> -> vector<8x64xf32>
    %c1_148 = arith.constant 1 : index
    %c0_149 = arith.constant 0 : index
    %c0_150 = arith.constant 0 : index
    %349 = vector.load %arg15[%c1_148, %c0_149, %c0_150] : memref<2x1x64xf32, #tpu.memory_space<vmem>>, vector<1x1x64xf32>
    %350 = vector.shape_cast %349 : vector<1x1x64xf32> to vector<1x64xf32>
    %351 = vector.broadcast %350 : vector<1x64xf32> to vector<8x64xf32>
    %352 = arith.addf %348, %351 : vector<8x64xf32>
    %cst_151 = arith.constant 1.702000e+00 : f32
    %353 = vector.broadcast %cst_151 : f32 to vector<8x64xf32>
    %354 = arith.mulf %353, %352 : vector<8x64xf32>
    %355 = arith.negf %354 : vector<8x64xf32>
    %356 = math.exp %355 : vector<8x64xf32>
    %cst_152 = arith.constant 1.000000e+00 : f32
    %357 = vector.broadcast %cst_152 : f32 to vector<8x64xf32>
    %358 = arith.addf %357, %356 : vector<8x64xf32>
    %359 = arith.divf %357, %358 : vector<8x64xf32>
    %360 = arith.mulf %352, %359 : vector<8x64xf32>
    %361 = arith.truncf %360 : vector<8x64xf32> to vector<8x64xbf16>
    %c1_153 = arith.constant 1 : index
    %c0_154 = arith.constant 0 : index
    %c0_155 = arith.constant 0 : index
    %362 = vector.load %arg16[%c1_153, %c0_154, %c0_155] : memref<2x64x32xbf16, #tpu.memory_space<vmem>>, vector<1x64x32xbf16>
    %363 = vector.shape_cast %362 : vector<1x64x32xbf16> to vector<64x32xbf16>
    %cst_156 = arith.constant dense<0.000000e+00> : vector<8x32xf32>
    %364 = tpu.matmul %361, %363, %cst_156 {dimension_numbers = #tpu.dot_dimension_numbers<[1], [0], [0], [1], [0, 0, 1, 1], [], []>} : vector<8x64xbf16>, vector<64x32xbf16>, vector<8x32xf32> -> vector<8x32xf32>
    %365 = arith.addf %320, %364 : vector<8x32xf32>
    %c1_157 = arith.constant 1 : index
    %c0_158 = arith.constant 0 : index
    %c0_159 = arith.constant 0 : index
    %366 = vector.load %arg17[%c1_157, %c0_158, %c0_159] : memref<2x1x32xf32, #tpu.memory_space<vmem>>, vector<1x1x32xf32>
    %367 = vector.shape_cast %366 : vector<1x1x32xf32> to vector<1x32xf32>
    %368 = vector.broadcast %367 : vector<1x32xf32> to vector<8x32xf32>
    %369 = arith.addf %365, %368 : vector<8x32xf32>
    %370 = vector.extract_strided_slice %369 {offsets = [0, 0], sizes = [1, 32], strides = [1, 1]} : vector<8x32xf32> to vector<1x32xf32>
    %c0_160 = arith.constant 0 : index
    %c0_161 = arith.constant 0 : index
    %371 = vector.load %arg18[%c0_160, %c0_161] : memref<1x32xf32, #tpu.memory_space<vmem>>, vector<1x32xf32>
    %c0_162 = arith.constant 0 : index
    %c0_163 = arith.constant 0 : index
    %372 = vector.load %arg19[%c0_162, %c0_163] : memref<1x32xf32, #tpu.memory_space<vmem>>, vector<1x32xf32>
    %cst_164 = arith.constant dense<0.000000e+00> : vector<1xf32>
    %373 = vector.multi_reduction <add>, %370, %cst_164 [1] : vector<1x32xf32> to vector<1xf32>
    %374 = vector.shape_cast %373 : vector<1xf32> to vector<1x1xf32>
    %cst_165 = arith.constant 3.200000e+01 : f32
    %375 = vector.broadcast %cst_165 : f32 to vector<1x1xf32>
    %376 = arith.divf %374, %375 : vector<1x1xf32>
    %377 = vector.broadcast %376 : vector<1x1xf32> to vector<1x32xf32>
    %378 = arith.subf %370, %377 : vector<1x32xf32>
    %379 = arith.mulf %378, %378 : vector<1x32xf32>
    %cst_166 = arith.constant dense<0.000000e+00> : vector<1xf32>
    %380 = vector.multi_reduction <add>, %379, %cst_166 [1] : vector<1x32xf32> to vector<1xf32>
    %381 = vector.shape_cast %380 : vector<1xf32> to vector<1x1xf32>
    %cst_167 = arith.constant 3.200000e+01 : f32
    %382 = vector.broadcast %cst_167 : f32 to vector<1x1xf32>
    %383 = arith.divf %381, %382 : vector<1x1xf32>
    %cst_168 = arith.constant 9.99999974E-6 : f32
    %384 = vector.broadcast %cst_168 : f32 to vector<1x1xf32>
    %385 = arith.addf %383, %384 : vector<1x1xf32>
    %386 = math.rsqrt %385 : vector<1x1xf32>
    %387 = vector.broadcast %386 : vector<1x1xf32> to vector<1x32xf32>
    %388 = arith.mulf %378, %387 : vector<1x32xf32>
    %389 = arith.mulf %388, %371 : vector<1x32xf32>
    %390 = arith.addf %389, %372 : vector<1x32xf32>
    %391 = vector.shape_cast %390 : vector<1x32xf32> to vector<1x1x32xf32>
    %c0_169 = arith.constant 0 : index
    %c0_170 = arith.constant 0 : index
    %c0_171 = arith.constant 0 : index
    %392 = vector.load %arg20[%c0_169, %c0_170, %c0_171] : memref<1x1x32xf32, #tpu.memory_space<vmem>>, vector<1x1x32xf32>
    tpu.vector_store %arg20[%c0_169, %c0_170, %c0_171], %391 {strides = array<i32>} : memref<1x1x32xf32, #tpu.memory_space<vmem>>, vector<1x1x32xf32>,
    return
  }
  func.func @transform_0(%arg0: i32) -> (i32, i32, i32) {
    %c0_i32 = arith.constant 0 : i32
    %c0_i32_0 = arith.constant 0 : i32
    %c0_i32_1 = arith.constant 0 : i32
    return %arg0, %c0_i32, %c0_i32_0 : i32, i32, i32
  }
  func.func @transform_1(%arg0: i32) -> (i32, i32) {
    %c0_i32 = arith.constant 0 : i32
    %c0_i32_0 = arith.constant 0 : i32
    %c0_i32_1 = arith.constant 0 : i32
    return %c0_i32, %c0_i32_0 : i32, i32
  }
  func.func @transform_2(%arg0: i32) -> (i32, i32) {
    %c0_i32 = arith.constant 0 : i32
    %c0_i32_0 = arith.constant 0 : i32
    %c0_i32_1 = arith.constant 0 : i32
    return %c0_i32, %c0_i32_0 : i32, i32
  }
  func.func @transform_3(%arg0: i32) -> (i32, i32) {
    %c0_i32 = arith.constant 0 : i32
    %c0_i32_0 = arith.constant 0 : i32
    %c0_i32_1 = arith.constant 0 : i32
    return %c0_i32, %c0_i32_0 : i32, i32
  }
  func.func @transform_4(%arg0: i32) -> (i32, i32) {
    %c0_i32 = arith.constant 0 : i32
    %c0_i32_0 = arith.constant 0 : i32
    %c0_i32_1 = arith.constant 0 : i32
    return %c0_i32, %c0_i32_0 : i32, i32
  }
  func.func @transform_5(%arg0: i32) -> (i32, i32, i32) {
    %c0_i32 = arith.constant 0 : i32
    %c0_i32_0 = arith.constant 0 : i32
    %c0_i32_1 = arith.constant 0 : i32
    %c0_i32_2 = arith.constant 0 : i32
    return %c0_i32, %c0_i32_0, %c0_i32_1 : i32, i32, i32
  }
  func.func @transform_6(%arg0: i32) -> (i32, i32, i32) {
    %c0_i32 = arith.constant 0 : i32
    %c0_i32_0 = arith.constant 0 : i32
    %c0_i32_1 = arith.constant 0 : i32
    %c0_i32_2 = arith.constant 0 : i32
    return %c0_i32, %c0_i32_0, %c0_i32_1 : i32, i32, i32
  }
  func.func @transform_7(%arg0: i32) -> (i32, i32, i32) {
    %c0_i32 = arith.constant 0 : i32
    %c0_i32_0 = arith.constant 0 : i32
    %c0_i32_1 = arith.constant 0 : i32
    %c0_i32_2 = arith.constant 0 : i32
    return %c0_i32, %c0_i32_0, %c0_i32_1 : i32, i32, i32
  }
  func.func @transform_8(%arg0: i32) -> (i32, i32, i32) {
    %c0_i32 = arith.constant 0 : i32
    %c0_i32_0 = arith.constant 0 : i32
    %c0_i32_1 = arith.constant 0 : i32
    %c0_i32_2 = arith.constant 0 : i32
    return %c0_i32, %c0_i32_0, %c0_i32_1 : i32, i32, i32
  }
  func.func @transform_9(%arg0: i32) -> (i32, i32, i32) {
    %c0_i32 = arith.constant 0 : i32
    %c0_i32_0 = arith.constant 0 : i32
    %c0_i32_1 = arith.constant 0 : i32
    %c0_i32_2 = arith.constant 0 : i32
    return %c0_i32, %c0_i32_0, %c0_i32_1 : i32, i32, i32
  }
  func.func @transform_10(%arg0: i32) -> (i32, i32, i32) {
    %c0_i32 = arith.constant 0 : i32
    %c0_i32_0 = arith.constant 0 : i32
    %c0_i32_1 = arith.constant 0 : i32
    %c0_i32_2 = arith.constant 0 : i32
    return %c0_i32, %c0_i32_0, %c0_i32_1 : i32, i32, i32
  }
  func.func @transform_11(%arg0: i32) -> (i32, i32, i32) {
    %c0_i32 = arith.constant 0 : i32
    %c0_i32_0 = arith.constant 0 : i32
    %c0_i32_1 = arith.constant 0 : i32
    %c0_i32_2 = arith.constant 0 : i32
    return %c0_i32, %c0_i32_0, %c0_i32_1 : i32, i32, i32
  }
  func.func @transform_12(%arg0: i32) -> (i32, i32, i32) {
    %c0_i32 = arith.constant 0 : i32
    %c0_i32_0 = arith.constant 0 : i32
    %c0_i32_1 = arith.constant 0 : i32
    %c0_i32_2 = arith.constant 0 : i32
    return %c0_i32, %c0_i32_0, %c0_i32_1 : i32, i32, i32
  }
  func.func @transform_13(%arg0: i32) -> (i32, i32, i32) {
    %c0_i32 = arith.constant 0 : i32
    %c0_i32_0 = arith.constant 0 : i32
    %c0_i32_1 = arith.constant 0 : i32
    %c0_i32_2 = arith.constant 0 : i32
    return %c0_i32, %c0_i32_0, %c0_i32_1 : i32, i32, i32
  }
  func.func @transform_14(%arg0: i32) -> (i32, i32, i32) {
    %c0_i32 = arith.constant 0 : i32
    %c0_i32_0 = arith.constant 0 : i32
    %c0_i32_1 = arith.constant 0 : i32
    %c0_i32_2 = arith.constant 0 : i32
    return %c0_i32, %c0_i32_0, %c0_i32_1 : i32, i32, i32
  }
  func.func @transform_15(%arg0: i32) -> (i32, i32, i32) {
    %c0_i32 = arith.constant 0 : i32
    %c0_i32_0 = arith.constant 0 : i32
    %c0_i32_1 = arith.constant 0 : i32
    %c0_i32_2 = arith.constant 0 : i32
    return %c0_i32, %c0_i32_0, %c0_i32_1 : i32, i32, i32
  }
  func.func @transform_16(%arg0: i32) -> (i32, i32, i32) {
    %c0_i32 = arith.constant 0 : i32
    %c0_i32_0 = arith.constant 0 : i32
    %c0_i32_1 = arith.constant 0 : i32
    %c0_i32_2 = arith.constant 0 : i32
    return %c0_i32, %c0_i32_0, %c0_i32_1 : i32, i32, i32
  }
  func.func @transform_17(%arg0: i32) -> (i32, i32) {
    %c0_i32 = arith.constant 0 : i32
    %c0_i32_0 = arith.constant 0 : i32
    %c0_i32_1 = arith.constant 0 : i32
    return %c0_i32, %c0_i32_0 : i32, i32
  }
  func.func @transform_18(%arg0: i32) -> (i32, i32) {
    %c0_i32 = arith.constant 0 : i32
    %c0_i32_0 = arith.constant 0 : i32
    %c0_i32_1 = arith.constant 0 : i32
    return %c0_i32, %c0_i32_0 : i32, i32
  }
  func.func @transform_19(%arg0: i32) -> (i32, i32, i32) {
    %c0_i32 = arith.constant 0 : i32
    %c0_i32_0 = arith.constant 0 : i32
    %c0_i32_1 = arith.constant 0 : i32
    return %arg0, %c0_i32, %c0_i32_0 : i32, i32, i32
  }
}

</mosaic_0001>

<bundles_post_ra>
// kernel: reference_encoder_forward.1
= control target key start
LH: loop header
LB: loop body
LE: loop exit
PB: predicated region body
PF: predicated region fallthrough
CT: control target
= control target key end

     0   :  { %s2845_s0 = inlined_call_operand.vmem [shape: bf16[2,8,192], index: 0, kind: input, shape index: {}]   ;;  %s2846_s1 = inlined_call_operand.vmem [shape: bf16[192,32], index: 1, kind: input, shape index: {}]   ;;  %s2847_s2 = inlined_call_operand.vmem [shape: f32[8,32], index: 2, kind: input, shape index: {}]   ;;  %s2848_s3 = inlined_call_operand.vmem [shape: f32[1,32], index: 3, kind: input, shape index: {}]   ;;  %s2849_s4 = inlined_call_operand.vmem [shape: f32[1,32], index: 4, kind: input, shape index: {}]   ;;  %s2850_s5 = inlined_call_operand.vmem [shape: f32[2,1,32], index: 5, kind: input, shape index: {}]   ;;  %s2851_s6 = inlined_call_operand.vmem [shape: f32[2,1,32], index: 6, kind: input, shape index: {}]   ;;  %s2852_s7 = inlined_call_operand.vmem [shape: bf16[2,32,96], index: 7, kind: input, shape index: {}]   ;;  %s2853_s8 = inlined_call_operand.vmem [shape: f32[2,1,96], index: 8, kind: input, shape index: {}]   ;;  %s2854_s9 = inlined_call_operand.vmem [shape: bf16[2,32,32], index: 9, kind: input, shape index: {}]   ;;  %s2855_s10 = inlined_call_operand.vmem [shape: f32[2,1,32], index: 10, kind: input, shape index: {}]   ;;  %s2856_s11 = inlined_call_operand.vmem [shape: f32[2,1,32], index: 11, kind: input, shape index: {}]   ;;  %s2857_s12 = inlined_call_operand.vmem [shape: f32[2,1,32], index: 12, kind: input, shape index: {}]   ;;  %s2858_s13 = inlined_call_operand.vmem [shape: bf16[2,32,64], index: 13, kind: input, shape index: {}]   ;;  %s2859_s14 = inlined_call_operand.vmem [shape: f32[2,1,64], index: 14, kind: input, shape index: {}]   ;;  %s2860_s15 = inlined_call_operand.vmem [shape: bf16[2,64,32], index: 15, kind: input, shape index: {}]   ;;  %s2861_s16 = inlined_call_operand.vmem [shape: f32[2,1,32], index: 16, kind: input, shape index: {}]   ;;  %s2862_s17 = inlined_call_operand.vmem [shape: f32[1,32], index: 17, kind: input, shape index: {}]   ;;  %s2863_s18 = inlined_call_operand.vmem [shape: f32[1,32], index: 18, kind: input, shape index: {}]   ;;  %s2864_s19 = inlined_call_operand.hbm [shape: f32[2,1,32], index: 19, kind: output, shape index: {}]  }
   0x1   :  { %2885 = sst [smem:[#allocation12_spill]] %s2845_s0 }
   0x2   :  { %2886 = sst [smem:[#allocation13_spill]] %s2846_s1 }
   0x3   :  { %2887 = sst [smem:[#allocation14_spill]] %s2847_s2 }
   0x4   :  { %2888 = sst [smem:[#allocation15_spill]] %s2848_s3 }
   0x5   :  { %2889 = sst [smem:[#allocation16_spill]] %s2849_s4 }
   0x6   :  { %2890 = sst [smem:[#allocation17_spill]] %s2863_s18 }
   0x7   :  { %24 = vsyncpa [#allocation3], 0 }
   0x8   :  { %26 = vsyncpa [#allocation3 + $0x1], 0  ;;  %s2424_s0 = smov 0   ;;  %s2426_s30 = smov 0  }
   0x9   :  { %s2428_s20 = smov 0   ;;  %s2430_s21 = smov 0  }
   0xa LB: > { %2891 = sst [smem:[#allocation5_spill]] %s2294_s0  ;;  %s2445_s1 = sadd.s32 4294967295, %s2306_s21   ;;  %s2306_s21 = sphi %s2430_s21, %s2921_s21   ;;  %s2302_s20 = sphi %s2428_s20, %s2923_s20   ;;  %s2298_s30 = sphi %s2426_s30, %s2925_s30   ;;  %s2294_s0 = sphi %s2424_s0, %s2924_s0  }
   0xb   : > { %2892 = sst [smem:[#allocation6_spill]] %s2302_s20  ;;  %s1893_s22 = sadd.s32 4294967294, %s2306_s21  }
   0xc   : > { %2893 = sst [smem:[#allocation7_spill]] %s2306_s21  ;;  %s2449_s2 = sadd.s32 1, %s2306_s21  }
   0xd   : > { %2894 = sst [smem:[#allocation8_spill]] %s2449_s2  ;;  %s443_s23 = sadd.s32 1, %s2302_s20 }
   0xe   : > { %s440_s24 = ssub.s32 %s2306_s21, %s2449_s2  ;;  %p453_p0 = scmp.ne.s32.totalorder %s2302_s20, %s2298_s30 }
   0xf   : > { %p441_p1 = scmp.eq.s32.totalorder %s440_s24, 0  ;;  %p454_p2 = scmp.eq.s32.totalorder %s2445_s1, 1 }
  0x10   : > { %p459_p3 = scmp.ne.s32.totalorder %s2298_s30, %s2294_s0  ;;  %p460_p4 = scmp.eq.s32.totalorder %s1893_s22, 1 }
  0x11   : > { %s2460_s25 = scalar_select %p441_p1, %s2302_s20, %s443_s23  }
  0x12   : > { %p2462_p5 = por %p454_p2, %p453_p0  ;;  %p2466_p6 = por %p460_p4, %p459_p3 }
  0x13   : > { %2895 = sst [smem:[#allocation9_spill]] %s2460_s25  ;;  %p1896_p7 = scmp.ge.s32.totalorder %s2306_s21, 1 }
  0x14   : > { %s2896_s3 = scalar_select %p2462_p5, 1, 0 }
  0x15   : > { %s2898_s26 = scalar_select %p2466_p6, 1, 0 }
  0x16   : > { %2897 = sst [smem:[#allocation10_spill]] %s2896_s3  ;;  %p540_p8 = scmp.lt.s32.totalorder %s2306_s21, 3 }
  0x17   : > { %2899 = sst [smem:[#allocation11_spill]] %s2898_s26 }
  0x18   : > { %p541_p9 = pnand %p1896_p7, %p540_p8 }
  0x19   : > { %s2900_s29 = sld [smem:[#allocation13_spill]] (!%p541_p9)  ;;  %p595_p10 = scmp.lt.s32.totalorder (!%p541_p9), %s2445_s1, 1 }
  0x1a   : > { %544 = sbr.rel (%p541_p9) target bundleno = 4901 (0x1325), region = 96  ;;  %s2901_s3 = sld [smem:[#allocation12_spill]] (!%p541_p9) }
  0x1b   : > { %s2902_s2 = sld [smem:[#allocation14_spill]] (!%p541_p9)  ;;  %s2878_s21 = smov (!%p541_p9), 64  }
  0x1c   : > { %s2903_s18 = sld [smem:[#allocation15_spill]] (!%p541_p9)  ;;  %s2883_s27 = smov (!%p541_p9), 120  }
  0x1d   : > { %s2904_s4 = sld [smem:[#allocation16_spill]] (!%p541_p9)  ;;  %s2882_s28 = smov (!%p541_p9), 112  }
  0x1e   : > { %s2884_s22 = smov (!%p541_p9), 72   ;;  %s2881_s23 = smov (!%p541_p9), 104  }
  0x1f   : > { %v2092_v0 = vld [vmem:[%s2900_s29 + $0x38] sm:$0xff]  ;;  %v2091_v2 = vld [vmem:[%s2900_s29 + $0x30] sm:$0xff]  ;;  %s596_s20 = scalar_select %p595_p10, %s2445_s1, 1  ;;  %v2090_v4 = vld [vmem:[%s2900_s29 + $0x28] sm:$0xff]  ;;  %vm705_vm0 = vcmask 523264   ;;  %vm737_vm1 = vcmask 261120  }
  0x20   : > { %v2096_v1 = vld [vmem:[%s2900_s29 + $0x58] sm:$0xff]  ;;  %709 = vmatpush.bf16.msra.mxu0 %v2092_v0  ;;  %v2095_v3 = vld [vmem:[%s2900_s29 + $0x50] sm:$0xff]  ;;  %v2094_v5 = vld [vmem:[%s2900_s29 + $0x48] sm:$0xff]  ;;  %v2308_v25 = vmov 32.0   ;;  %vm854_vm9 = vcmask 64512   ;;  %vm893_vm10 = vcmask 1043456  }
  0x21   : > { %726 = vmatpush.bf16.msra.mxu1 %v2096_v1  ;;  %s2084_s0 = sshll.u32 %s596_s20, 3  ;;  %v2089_v7 = vld [vmem:[%s2900_s29 + $0x20] sm:$0xff]  ;;  %v2088_v10 = vld [vmem:[%s2900_s29 + $0x18] sm:$0xff]  ;;  %v2087_v12 = vld [vmem:[%s2900_s29 + $0x10] sm:$0xff]  ;;  %2190 = vrcp.f32 %v2308_v25  ;;  %s2877_s24 = smov 40   ;;  %vm1097_vm12 = vcmask 130048  }
  0x22   : > { %s599_s25 = scalar_lea.vmem %s2901_s3, %s2084_s0  ;;  %v2093_v9 = vld [vmem:[%s2900_s29 + $0x40] sm:$0xff]  ;;  %v2086_v13 = vld [vmem:[%s2900_s29 + $0x8] sm:$0xff]  ;;  %s2311_s0 = smov 96   ;;  %vm1099_vm13 = vcmask 195584  }
  0x23   : > { %v601_v6 = vld [vmem:[%s599_s25] sm:$0xff]  ;;  %v2098_v58 = vld [vmem:[%s2852_s7 + $0x8] sm:$0xff]  ;;  %s2312_s3 = smov 80   ;;  %s2876_s25 = smov 56  }
  0x24   : > { %710 = vmatpush.bf16.msra.mxu0 %v2091_v2  ;;  %v629_v8 = vunpack.c.h.b16 %v601_v6  ;;  %v628_v14 = vunpack.c.l.b16 %v601_v6  ;;  %v2085_v15 = vld [vmem:[%s2900_s29] sm:$0xff]  ;;  %841 = vmatpush.bf16.msra.mxu2 %v2098_v58  ;;  %s2875_s26 = smov 8   ;;  %s2879_s20 = smov 16  }
  0x25   : > { %727 = vmatpush.bf16.msra.mxu1 %v2095_v3  ;;  %v626_v19 = vld [vmem:[%s2902_s2] sm:$0xff]  ;;  %s2874_s2 = smov 48  }
  0x26   : > { %v631_v11 = vpack.c.b16 %v629_v8, %v629_v8  ;;  %v630_v16 = vpack.c.b16 %v628_v14, %v628_v14  ;;  %v2172_v46 = vld [vmem:[%s2903_s18] ss:$0 sm:$0xff]  ;;  %s2309_s18 = smov 88  }
  0x27   : > { %v2191_v26 = vpop.eup %2190  ;;  %v2173_v49 = vld [vmem:[%s2904_s4] ss:$0 sm:$0xff] }
  0x28   : > { %711 = vmatpush.bf16.msra.mxu0 %v2090_v4  ;;  %v742_v27 = vmul.f32 32.0, %v2191_v26  ;;  %vm746_vm2 = vweird.f32 %v2191_v26  ;;  %v2097_v59 = vld [vmem:[%s2852_s7] sm:$0xff] }
  0x29   : > { %728 = vmatpush.bf16.msra.mxu1 %v2094_v5  ;;  %842 = vmatpush.bf16.msra.mxu2 %v2097_v59  ;;  %v2174_v5 = vld [vmem:[%s2850_s5] ss:$0 sm:$0xff] }
  0x2a   : > { %v743_v28 = vsub.f32 1.0, %v742_v27  ;;  %v2175_v8 = vld [vmem:[%s2851_s6] ss:$0 sm:$0xff] }
  0x2c   : > { %712 = vmatpush.bf16.msra.mxu0 %v2089_v7  ;;  %v744_v29 = vmul.f32 %v2191_v26, %v743_v28  ;;  %v775_v28 = vlaneseq }
  0x2d   : > { %729 = vmatpush.bf16.msra.mxu1 %v2093_v9 }
  0x2e   : > { %v745_v30 = vadd.f32 %v2191_v26, %v744_v29  ;;  %v776_v29 = vand.u32 127, %v775_v28 }
  0x30   : > { %713 = vmatpush.bf16.msra.mxu0 %v2088_v10  ;;  %1947 = vmatmul.msk.bf16.vlgmr.msra.gmra.mxu1 %vm705_vm0, %v631_v11  ;;  %v2518_v31 = vsel %vm746_vm2, %v2191_v26, %v745_v30  ;;  %vm777_vm11 = vcmp.ge.s32.totalorder %v776_v29, 5 }
  0x34   : > { %714 = vmatpush.bf16.msra.mxu0 %v2087_v12  ;;  %v2176_v12 = vld [vmem:[%s2853_s8] ss:$0 sm:$0xff] }
  0x38   : > { %715 = vmatpush.bf16.msra.mxu0 %v2086_v13 }
  0x3c   : > { %716 = vmatpush.bf16.msra.mxu0 %v2085_v15 }
  0x3f   : > { %717 = vmatmul.bf16.vlgmr.msra.gmra.mxu0 %v630_v16 }
  0xad   : > { %v731_v17 = vpop.f32.mrf.mxu1 }
  0xb5   : > { %v733_v18 = vpop.f32.mrf.mxu1 }
  0xbc   : > { %v718_v20 = vpop.f32.mrf.mxu0 }
  0xbd   : > { %v719_v21 = vadd.f32 %v718_v20, %v626_v19 }
  0xbf   : > { %v732_v22 = vadd.f32 %v731_v17, %v719_v21 }
  0xc1   : > { %v738_v23 = vsel %vm737_vm1, %v732_v22, 0.0 }
  0xc2   : > { %739 = vadd.xlane.f32.xlu0 %v738_v23 }
  0xc4   : > { %v720_v24 = vpop.f32.mrf.mxu0 }
 0x135   : > { %v740_v32 = vpop.xlane.xlu0 %739 }
 0x136   : > { %v748_v33 = vmul.f32 %v2518_v31, %v740_v32  ;;  %v2315_v32 = vmov 0.0  }
 0x138   : > { %v749_v34 = vsub.f32 %v732_v22, %v748_v33  ;;  %v2573_v33 = vsel %vm777_vm11, -1e+30, %v2315_v32 }
 0x13a   : > { %v750_v35 = vmul.f32 %v749_v34, %v749_v34 }
 0x13c   : > { %v751_v36 = vsel %vm737_vm1, %v750_v35, 0.0 }
 0x13d   : > { %752 = vadd.xlane.f32.xlu0 %v751_v36 }
 0x1b0   : > { %v753_v37 = vpop.xlane.xlu0 %752 }
 0x1b1   : > { %v754_v38 = vmul.f32 %v753_v37, %v2518_v31 }
 0x1b3   : > { %v755_v39 = vadd.f32 1e-05, %v754_v38 }
 0x1b5   : > { %2192 = vrsqrt.f32 %v755_v39  ;;  %vm762_vm4 = vweird.f32 %v755_v39 }
 0x1bb   : > { %v2193_v40 = vpop.eup %2192 }
 0x1bc   : > { %v757_v41 = vmul.f32 %v2193_v40, %v755_v39  ;;  %vm763_vm3 = vweird.f32 %v2193_v40 }
 0x1bd   : > { %vm764_vm5 = vmor %vm762_vm4, %vm763_vm3 }
 0x1be   : > { %v758_v42 = vmul.f32 %v2193_v40, %v757_v41 }
 0x1c0   : > { %v759_v43 = vmul.f32 0.5, %v758_v42 }
 0x1c2   : > { %v760_v44 = vsub.f32 1.5, %v759_v43 }
 0x1c4   : > { %v761_v45 = vmul.f32 %v2193_v40, %v760_v44 }
 0x1c6   : > { %v765_v47 = vsel %vm764_vm5, %v2193_v40, %v761_v45 }
 0x1c7   : > { %v766_v48 = vmul.f32 %v765_v47, %v749_v34 }
 0x1c9   : > { %v770_v50 = vmul.f32 %v2172_v46, %v766_v48 }
 0x1cb   : > { %v2529_v51 = vadd.f32 %v2173_v49, %v770_v50 }
 0x1cd   : > { %v781_v52 = vsel %vm737_vm1, %v2529_v51, 0.0 }
 0x1ce   : > { %782 = vadd.xlane.f32.xlu1 %v781_v52 }
 0x241   : > { %v783_v53 = vpop.xlane.xlu1 %782 }
 0x242   : > { %v784_v54 = vmul.f32 %v783_v53, %v2518_v31 }
 0x244   : > { %v785_v55 = vsub.f32 %v2529_v51, %v784_v54 }
 0x246   : > { %v786_v56 = vmul.f32 %v785_v55, %v785_v55 }
 0x248   : > { %v787_v57 = vsel %vm737_vm1, %v786_v56, 0.0 }
 0x249   : > { %788 = vadd.xlane.f32.xlu1 %v787_v57 }
 0x2bc   : > { %v789_v60 = vpop.xlane.xlu1 %788 }
 0x2bd   : > { %v790_v61 = vmul.f32 %v789_v60, %v2518_v31 }
 0x2bf   : > { %v791_v62 = vadd.f32 1e-05, %v790_v61 }
 0x2c1   : > { %2194 = vrsqrt.f32 %v791_v62  ;;  %vm798_vm7 = vweird.f32 %v791_v62 }
 0x2c7   : > { %v2195_v63 = vpop.eup %2194 }
 0x2c8   : > { %v793_v0 = vmul.f32 %v2195_v63, %v791_v62  ;;  %vm799_vm6 = vweird.f32 %v2195_v63 }
 0x2c9   : > { %vm800_vm8 = vmor %vm798_vm7, %vm799_vm6 }
 0x2ca   : > { %v794_v1 = vmul.f32 %v2195_v63, %v793_v0 }
 0x2cc   : > { %v795_v2 = vmul.f32 0.5, %v794_v1 }
 0x2ce   : > { %v796_v3 = vsub.f32 1.5, %v795_v2 }
 0x2d0   : > { %v797_v4 = vmul.f32 %v2195_v63, %v796_v3 }
 0x2d2   : > { %v801_v6 = vsel %vm800_vm8, %v2195_v63, %v797_v4 }
 0x2d3   : > { %v802_v7 = vmul.f32 %v801_v6, %v785_v55 }
 0x2d5   : > { %v806_v9 = vmul.f32 %v2174_v5, %v802_v7 }
 0x2d7   : > { %v810_v10 = vadd.f32 %v2175_v8, %v806_v9 }
 0x2d9   : > { %v811_v11 = vpack.c.bf16 %v810_v10, %v810_v10 }
 0x2db   : > { %1956 = vmatmul.msk.bf16.vlgmr.msra.gmra.mxu2 %vm737_vm1, %v811_v11 }
 0x35e   : > { %v844_v13 = vpop.f32.mrf.mxu2 }
 0x35f   : > { %v845_v14 = vadd.f32 %v2176_v12, %v844_v13 }
 0x361   : > { %v848_v15 = vpack.c.bf16 %v845_v14, %v845_v14 }
 0x363   : > { %v850_v16 = vunpack.c.l.b16 %v848_v15 }
 0x365   : > { %v2553_v17 = vpack.c.b16 %v850_v16, %v850_v16 }
 0x366   : > { %v846_v18 = vpop.f32.mrf.mxu2 }
 0x367   : > { %912 = vrot.lane.b32.xlu0 %v2553_v17, %s2309_s18  ;;  %888 = vrot.lane.b32.xlu1 %v2553_v17, %s2878_s21  ;;  %s2912_s21 = smov 48  }
 0x368   : > { %852 = vrot.lane.b32.xlu2 %v2553_v17, %s2311_s0 }
 0x36f   : > { %970 = vrot.lane.b32.xlu0 %v2553_v17, %s2312_s3  ;;  %910 = vrot.lane.b32.xlu1 %v2553_v17, %s2883_s27  ;;  %s593_s27 = sand.u32 1, %s2298_s30  }
 0x377   : > { %968 = vrot.lane.b32.xlu1 %v2553_v17, %s2882_s28 }
 0x3c2   : > { %v853_v19 = vpop.permute.xlu2 %852 }
 0x3c3   : > { %v859_v20 = vsel %vm854_vm9, %v853_v19, 0 }
 0x3c4   : > { %868 = vmatpush.bf16.xpose.msra.mxu3 %v859_v20 }
 0x3cb   : > { %1957 = vmatmul.msk.bf16.vlgmr.msra.gmra.mxu3 %vm854_vm9, %v848_v15 }
 0x3d9   : > { %v913_v21 = vpop.permute.xlu0 %912  ;;  %v889_v22 = vpop.permute.xlu1 %888 }
 0x3da   : > { %v895_v23 = vsel %vm893_vm10, %v889_v22, 0  ;;  %v918_v24 = vsel %vm854_vm9, %v913_v21, 0 }
 0x3db   : > { %904 = vmatpush.bf16.msrb.mxu2 %v895_v23  ;;  %927 = vmatpush.bf16.xpose.msrb.mxu3 %v918_v24 }
 0x3e1   : > { %v971_v25 = vpop.permute.xlu0 %970  ;;  %v911_v26 = vpop.permute.xlu1 %910 }
 0x3e2   : > { %v976_v27 = vsel %vm854_vm9, %v971_v25, 0  ;;  %1959 = vmatmul.msk.bf16.vlgmr.msrb.gmra.mxu3 %vm854_vm9, %v911_v26 }
 0x3e3   : > { %985 = vmatpush.bf16.xpose.msra.mxu2 %v976_v27 }
 0x3e9   : > { %v969_v50 = vpop.permute.xlu1 %968 }
 0x44e   : > { %v870_v30 = vpop.f32.mrf.mxu3 }
 0x44f   : > { %v874_v34 = vmul.f32 0.35355338, %v870_v30 }
 0x451   : > { %v875_v35 = vadd.f32 %v874_v34, %v2573_v33 }
 0x453   : > { %v876_v36 = vsel %vm854_vm9, %v875_v35, -inf }
 0x454   : > { %877 = vmax.xlane.f32.xlu2 %v876_v36 }
 0x456   : > { %v872_v37 = vpop.f32.mrf.mxu3 }
 0x465   : > { %v929_v38 = vpop.f32.mrf.mxu3 }
 0x466   : > { %v933_v39 = vmul.f32 0.35355338, %v929_v38 }
 0x468   : > { %v934_v40 = vadd.f32 %v933_v39, %v2573_v33 }
 0x46a   : > { %v935_v41 = vsel %vm854_vm9, %v934_v40, -inf }
 0x46b   : > { %936 = vmax.xlane.f32.xlu1 %v935_v41 }
 0x46c   : > { %1028 = vrot.lane.b32.xlu2 %v2553_v17, %s2884_s22  ;;  %s2905_s22 = smov 72  }
 0x46d   : > { %v931_v42 = vpop.f32.mrf.mxu3 }
 0x4c7   : > { %v878_v43 = vpop.xlane.xlu2 %877 }
 0x4c8   : > { %v879_v44 = vsub.f32 %v875_v35, %v878_v43 }
 0x4ca   : > { %v880_v45 = vmul.f32 1.442695, %v879_v44 }
 0x4cc   : > { %2196 = vpow2.f32 %v880_v45 }
 0x4cf   : > { %v1029_v46 = vpop.permute.xlu2 %1028 }
 0x4d0   : > { %v1034_v47 = vsel %vm854_vm9, %v1029_v46, 0  ;;  %v2100_v46 = vld [vmem:[%s2854_s9 + $0x8] sm:$0xff] }
 0x4d1   : > { %1043 = vmatpush.bf16.xpose.msrb.mxu0 %v1034_v47  ;;  %v2099_v47 = vld [vmem:[%s2854_s9] sm:$0xff] }
 0x4d2   : > { %v2197_v48 = vpop.eup %2196 }
 0x4d3   : > { %v882_v49 = vsel %vm854_vm9, %v2197_v48, 0.0 }
 0x4d4   : > { %883 = vadd.xlane.f32.xlu0 %v882_v49 }
 0x4de   : > { %v937_v52 = vpop.xlane.xlu1 %936 }
 0x4df   : > { %v938_v53 = vsub.f32 %v934_v40, %v937_v52 }
 0x4e1   : > { %v939_v54 = vmul.f32 1.442695, %v938_v53 }
 0x4e3   : > { %2198 = vpow2.f32 %v939_v54 }
 0x4e8   : > { %1026 = vrot.lane.b32.xlu0 %v2553_v17, %s2881_s23  ;;  %s2906_s23 = smov 120  }
 0x4e9   : > { %v2199_v55 = vpop.eup %2198 }
 0x4ea   : > { %v941_v56 = vsel %vm854_vm9, %v2199_v55, 0.0 }
 0x4eb   : > { %942 = vadd.xlane.f32.xlu1 %v941_v56  ;;  %v2177_v56 = vld [vmem:[%s2855_s10] ss:$0 sm:$0xff] }
 0x547   : > { %v884_v57 = vpop.xlane.xlu0 %883 }
 0x548   : > { %2200 = vrcp.f32 %v884_v57 }
 0x54e   : > { %v2201_v58 = vpop.eup %2200 }
 0x54f   : > { %v886_v59 = vmul.f32 %v2201_v58, %v2197_v48 }
 0x551   : > { %v887_v60 = vpack.c.bf16 %v886_v59, %v886_v59 }
 0x553   : > { %1958 = vmatmul.msk.bf16.vlgmr.msrb.gmra.mxu2 %vm854_vm9, %v887_v60 }
 0x554   : > { %1131 = vmatpush.bf16.msrb.mxu2 %v2100_v46  ;;  %v2181_v46 = vld [vmem:[%s2861_s16] ss:$0 sm:$0xff] }
 0x558   : > { %1132 = vmatpush.bf16.msrb.mxu2 %v2099_v47 }
 0x55a   : > { %v1027_v61 = vpop.permute.xlu0 %1026 }
 0x55b   : > { %1963 = vmatmul.msk.bf16.vlgmr.msrb.gmra.mxu0 %vm854_vm9, %v1027_v61 }
 0x55e   : > { %v943_v19 = vpop.xlane.xlu1 %942 }
 0x563   : > { %1961 = vmatmul.msk.bf16.vlgmr.msra.gmra.mxu2 %vm854_vm9, %v969_v50 }
 0x5d6   : > { %v2589_v62 = vpop.f32.mrf.mxu2 }
 0x5d8   : > { %v1045_v63 = vpop.f32.mrf.mxu0 }
 0x5d9   : > { %v1049_v0 = vmul.f32 0.35355338, %v1045_v63 }
 0x5db   : > { %v1050_v1 = vadd.f32 %v1049_v0, %v2573_v33 }
 0x5dd   : > { %v1051_v2 = vsel %vm854_vm9, %v1050_v1, -inf }
 0x5de   : > { %v908_v3 = vpop.f32.mrf.mxu2  ;;  %1052 = vmax.xlane.f32.xlu2 %v1051_v2 }
 0x5df   : > { %v2102_v3 = vld [vmem:[%s2858_s13 + $0x8] sm:$0xff] }
 0x5e0   : > { %v1047_v4 = vpop.f32.mrf.mxu0 }
 0x5e6   : > { %v987_v5 = vpop.f32.mrf.mxu2 }
 0x5e7   : > { %v991_v6 = vmul.f32 0.35355338, %v987_v5 }
 0x5e9   : > { %v992_v7 = vadd.f32 %v991_v6, %v2573_v33 }
 0x5eb   : > { %v993_v8 = vsel %vm854_vm9, %v992_v7, -inf }
 0x5ec   : > { %994 = vmax.xlane.f32.xlu0 %v993_v8 }
 0x5ee   : > { %v989_v9 = vpop.f32.mrf.mxu2 }
 0x600   : > { %947 = vrot.lane.b32.xlu0 %v2553_v17, %s2876_s25  ;;  %s2914_s25 = smov 24  }
 0x608   : > { %1063 = vrot.lane.b32.xlu0 %v2553_v17, %s2877_s24  ;;  %s2913_s24 = smov 8  }
 0x651   : > { %v1053_v10 = vpop.xlane.xlu2 %1052 }
 0x652   : > { %v1054_v11 = vsub.f32 %v1050_v1, %v1053_v10 }
 0x654   : > { %v1055_v12 = vmul.f32 1.442695, %v1054_v11 }
 0x656   : > { %2202 = vpow2.f32 %v1055_v12 }
 0x65c   : > { %v2203_v13 = vpop.eup %2202 }
 0x65d   : > { %v1057_v14 = vsel %vm854_vm9, %v2203_v13, 0.0 }
 0x65e   : > { %1058 = vadd.xlane.f32.xlu2 %v1057_v14 }
 0x65f   : > { %v995_v15 = vpop.xlane.xlu0 %994 }
 0x660   : > { %v996_v16 = vsub.f32 %v992_v7, %v995_v15 }
 0x662   : > { %v997_v18 = vmul.f32 1.442695, %v996_v16  ;;  %v2179_v16 = vld [vmem:[%s2857_s12] ss:$0 sm:$0xff] }
 0x664   : > { %2204 = vpow2.f32 %v997_v18 }
 0x665   : > { %2206 = vrcp.f32 %v943_v19 }
 0x66a   : > { %v2205_v20 = vpop.eup %2204 }
 0x66b   : > { %v999_v21 = vsel %vm854_vm9, %v2205_v20, 0.0  ;;  %v2207_v22 = vpop.eup %2206 }
 0x66c   : > { %1000 = vadd.xlane.f32.xlu1 %v999_v21  ;;  %v945_v23 = vmul.f32 %v2207_v22, %v2199_v55  ;;  %v2106_v21 = vld [vmem:[%s2860_s15 + $0x18] sm:$0xff]  ;;  %v2105_v22 = vld [vmem:[%s2860_s15 + $0x10] sm:$0xff] }
 0x66d   : > { %1269 = vmatpush.bf16.msra.mxu0 %v2106_v21 }
 0x66e   : > { %v946_v26 = vpack.c.bf16 %v945_v23, %v945_v23  ;;  %v2104_v23 = vld [vmem:[%s2860_s15 + $0x8] sm:$0xff] }
 0x671   : > { %1270 = vmatpush.bf16.msra.mxu0 %v2105_v22 }
 0x672   : > { %v948_v24 = vpop.permute.xlu0 %947 }
 0x673   : > { %v953_v25 = vsel %vm893_vm10, %v948_v24, 0  ;;  %v2180_v24 = vld [vmem:[%s2859_s14] ss:$0 sm:$0xff] }
 0x674   : > { %962 = vmatpush.bf16.msrb.mxu1 %v953_v25 }
 0x675   : > { %1271 = vmatpush.bf16.msra.mxu0 %v2104_v23 }
 0x677   : > { %1960 = vmatmul.msk.bf16.vlgmr.msrb.gmra.mxu1 %vm854_vm9, %v946_v26  ;;  %v2103_v26 = vld [vmem:[%s2860_s15] sm:$0xff] }
 0x679   : > { %1272 = vmatpush.bf16.msra.mxu0 %v2103_v26 }
 0x67a   : > { %v1064_v27 = vpop.permute.xlu0 %1063 }
 0x67b   : > { %v1069_v28 = vsel %vm893_vm10, %v1064_v27, 0 }
 0x67c   : > { %1078 = vmatpush.bf16.msra.mxu1 %v1069_v28 }
 0x685   : > { %1005 = vrot.lane.b32.xlu1 %v2553_v17, %s2874_s2  ;;  %s2880_s2 = smov 24  }
 0x6d1   : > { %v1059_v29 = vpop.xlane.xlu2 %1058 }
 0x6d2   : > { %2208 = vrcp.f32 %v1059_v29 }
 0x6d8   : > { %v2209_v30 = vpop.eup %2208 }
 0x6d9   : > { %v1061_v32 = vmul.f32 %v2209_v30, %v2203_v13  ;;  %v2178_v13 = vld [vmem:[%s2856_s11] ss:$0 sm:$0xff] }
 0x6db   : > { %v1062_v34 = vpack.c.bf16 %v1061_v32, %v1061_v32 }
 0x6dd   : > { %1964 = vmatmul.msk.bf16.vlgmr.msra.gmra.mxu1 %vm854_vm9, %v1062_v34 }
 0x6df   : > { %v1001_v35 = vpop.xlane.xlu1 %1000 }
 0x6e0   : > { %2210 = vrcp.f32 %v1001_v35 }
 0x6e6   : > { %v2211_v36 = vpop.eup %2210 }
 0x6e7   : > { %v1003_v38 = vmul.f32 %v2211_v36, %v2205_v20 }
 0x6e9   : > { %v1004_v17 = vpack.c.bf16 %v1003_v38, %v1003_v38 }
 0x6f4   : > { %v964_v37 = vpop.f32.mrf.mxu1 }
 0x6f5   : > { %1085 = vrot.lane.b32.xlu2 %v964_v37, %s2875_s26  ;;  %s2915_s26 = smov 16  }
 0x6f7   : > { %v1006_v39 = vpop.permute.xlu1 %1005 }
 0x6f8   : > { %v1011_v40 = vsel %vm893_vm10, %v1006_v39, 0 }
 0x6f9   : > { %1020 = vmatpush.bf16.msra.mxu3 %v1011_v40 }
 0x6fc   : > { %v966_v41 = vpop.f32.mrf.mxu1  ;;  %1962 = vmatmul.msk.bf16.vlgmr.msra.gmra.mxu3 %vm854_vm9, %v1004_v17 }
 0x6fd   : > { %1201 = vmatpush.bf16.msrb.mxu3 %v2102_v3 }
 0x74f   : > { %v1086_v49 = vpop.permute.xlu2 %1085 }
 0x750   : > { %v1096_v50 = vsel %vm854_vm9, %v2589_v62, %v1086_v49 }
 0x75a   : > { %v1080_v42 = vpop.f32.mrf.mxu1 }
 0x762   : > { %v1082_v43 = vpop.f32.mrf.mxu1 }
 0x77f   : > { %v1022_v44 = vpop.f32.mrf.mxu3 }
 0x780   : > { %1089 = vrot.lane.b32.xlu0 %v1022_v44, %s2879_s20  ;;  %s2908_s20 = smov 104  }
 0x787   : > { %v1024_v45 = vpop.f32.mrf.mxu3 }
 0x788   : > { %1093 = vrot.lane.b32.xlu0 %v1080_v42, %s2880_s2  ;;  %s2907_s2 = smov 112  }
 0x7f2   : > { %v1090_v48 = vpop.permute.xlu0 %1089 }
 0x7f3   : > { %v1098_v52 = vsel %vm1097_vm12, %v1096_v50, %v1090_v48 }
 0x7fa   : > { %v1094_v53 = vpop.permute.xlu0 %1093 }
 0x7fb   : > { %v1100_v54 = vsel %vm1099_vm13, %v1098_v52, %v1094_v53 }
 0x7fc   : > { %v1101_v55 = vpack.c.bf16 %v1100_v54, %v1100_v54 }
 0x7fe   : > { %1973 = vmatmul.msk.bf16.vlgmr.msrb.gmra.mxu2 %vm737_vm1, %v1101_v55 }
 0x881   : > { %v1134_v57 = vpop.f32.mrf.mxu2 }
 0x882   : > { %v1135_v58 = vadd.f32 %v2177_v56, %v1134_v57 }
 0x884   : > { %v2627_v59 = vadd.f32 %v1135_v58, %v2529_v51  ;;  %v2101_v51 = vld [vmem:[%s2858_s13] sm:$0xff]  ;;  %v2108_v58 = vld [vmem:[%s2852_s7 + $0x18] sm:$0xff] }
 0x885   : > { %1202 = vmatpush.bf16.msrb.mxu3 %v2101_v51  ;;  %1350 = vmatpush.bf16.msrb.mxu1 %v2108_v58 }
 0x886   : > { %v1141_v60 = vsel %vm737_vm1, %v2627_v59, 0.0 }
 0x887   : > { %1142 = vadd.xlane.f32.xlu1 %v1141_v60 }
 0x889   : > { %v1136_v61 = vpop.f32.mrf.mxu2 }
 0x8fa   : > { %v1143_v62 = vpop.xlane.xlu1 %1142 }
 0x8fb   : > { %v1144_v63 = vmul.f32 %v1143_v62, %v2518_v31 }
 0x8fd   : > { %v1145_v0 = vsub.f32 %v2627_v59, %v1144_v63 }
 0x8ff   : > { %v1146_v1 = vmul.f32 %v1145_v0, %v1145_v0 }
 0x901   : > { %v1147_v2 = vsel %vm737_vm1, %v1146_v1, 0.0 }
 0x902   : > { %1148 = vadd.xlane.f32.xlu0 %v1147_v2 }
 0x975   : > { %v1149_v4 = vpop.xlane.xlu0 %1148 }
 0x976   : > { %v1150_v5 = vmul.f32 %v1149_v4, %v2518_v31  ;;  %v2182_v4 = vld [vmem:[%s2850_s5 + $0x1] ss:$0 sm:$0xff] }
 0x978   : > { %v1151_v6 = vadd.f32 1e-05, %v1150_v5 }
 0x97a   : > { %2212 = vrsqrt.f32 %v1151_v6  ;;  %vm1158_vm15 = vweird.f32 %v1151_v6 }
 0x980   : > { %v2213_v7 = vpop.eup %2212 }
 0x981   : > { %v1153_v8 = vmul.f32 %v2213_v7, %v1151_v6  ;;  %vm1159_vm14 = vweird.f32 %v2213_v7 }
 0x982   : > { %vm1160_vm2 = vmor %vm1158_vm15, %vm1159_vm14 }
 0x983   : > { %v1154_v9 = vmul.f32 %v2213_v7, %v1153_v8 }
 0x985   : > { %v1155_v10 = vmul.f32 0.5, %v1154_v9 }
 0x987   : > { %v1156_v11 = vsub.f32 1.5, %v1155_v10 }
 0x989   : > { %v1157_v12 = vmul.f32 %v2213_v7, %v1156_v11  ;;  %v2184_v11 = vld [vmem:[%s2853_s8 + $0x1] ss:$0 sm:$0xff] }
 0x98b   : > { %v1161_v14 = vsel %vm1160_vm2, %v2213_v7, %v1157_v12  ;;  %v2183_v7 = vld [vmem:[%s2851_s6 + $0x1] ss:$0 sm:$0xff]  ;;  %vm1799_vm2 = vcmask 253952  }
 0x98c   : > { %v1162_v15 = vmul.f32 %v1161_v14, %v1145_v0 }
 0x98e   : > { %v1166_v18 = vmul.f32 %v2178_v13, %v1162_v15 }
 0x990   : > { %v1170_v19 = vadd.f32 %v2179_v16, %v1166_v18 }
 0x992   : > { %v1171_v20 = vpack.c.bf16 %v1170_v19, %v1170_v19 }
 0x994   : > { %1982 = vmatmul.msk.bf16.vlgmr.msrb.gmra.mxu3 %vm737_vm1, %v1171_v20 }
 0xa17   : > { %v1204_v25 = vpop.f32.mrf.mxu3 }
 0xa18   : > { %v1205_v27 = vadd.f32 %v2180_v24, %v1204_v25 }
 0xa1a   : > { %v1983_v28 = vmul.f32 -1.702, %v1205_v27 }
 0xa1c   : > { %v1210_v29 = vmul.f32 1.442695, %v1983_v28 }
 0xa1e   : > { %2214 = vpow2.f32 %v1210_v29 }
 0xa1f   : > { %v1206_v30 = vpop.f32.mrf.mxu3 }
 0xa24   : > { %v2215_v32 = vpop.eup %2214 }
 0xa25   : > { %v1212_v34 = vadd.f32 1.0, %v2215_v32 }
 0xa27   : > { %2216 = vrcp.f32 %v1212_v34  ;;  %v1224_v38 = vand.u32 2147483648, %v1212_v34  ;;  %v1222_v40 = vand.u32 2147483647, %v1212_v34  ;;  %vm1218_vm4 = vweird.f32 %v1212_v34 }
 0xa29   : > { %v1225_v41 = vor.u32 1.1754944e-38, %v1224_v38  ;;  %vm1223_vm6 = vcmp.eq.f32.partialorder %v1222_v40, 8.507059e+37 }
 0xa2d   : > { %v2217_v35 = vpop.eup %2216 }
 0xa2e   : > { %v1214_v36 = vmul.f32 %v2217_v35, %v1212_v34  ;;  %vm1219_vm3 = vweird.f32 %v2217_v35 }
 0xa2f   : > { %vm1220_vm5 = vmor %vm1218_vm4, %vm1219_vm3 }
 0xa30   : > { %v1215_v37 = vsub.f32 1.0, %v1214_v36 }
 0xa32   : > { %v1216_v39 = vmul.f32 %v2217_v35, %v1215_v37 }
 0xa34   : > { %v1217_v17 = vadd.f32 %v2217_v35, %v1216_v39 }
 0xa36   : > { %v1221_v42 = vsel %vm1220_vm5, %v2217_v35, %v1217_v17 }
 0xa37   : > { %v1226_v43 = vsel %vm1223_vm6, %v1225_v41, %v1221_v42 }
 0xa38   : > { %v1228_v44 = vmul.f32 %v1226_v43, %v1205_v27 }
 0xa3a   : > { %v1229_v45 = vpack.c.bf16 %v1228_v44, %v1228_v44 }
 0xa3c   : > { %2000 = vmatmul.msk.bf16.vlgmr.msra.gmra.mxu0 %vm705_vm0, %v1229_v45 }
 0xab9   : > { %v1274_v47 = vpop.f32.mrf.mxu0 }
 0xaba   : > { %v1278_v48 = vadd.f32 %v1274_v47, %v2627_v59  ;;  %v2107_v59 = vld [vmem:[%s2852_s7 + $0x10] sm:$0xff] }
 0xabb   : > { %1351 = vmatpush.bf16.msrb.mxu1 %v2107_v59 }
 0xabc   : > { %v2668_v49 = vadd.f32 %v2181_v46, %v1278_v48 }
 0xabe   : > { %v1288_v50 = vsel %vm737_vm1, %v2668_v49, 0.0 }
 0xabf   : > { %1289 = vadd.xlane.f32.xlu2 %v1288_v50 }
 0xac1   : > { %v1276_v52 = vpop.f32.mrf.mxu0 }
 0xb32   : > { %v1290_v53 = vpop.xlane.xlu2 %1289 }
 0xb33   : > { %v1291_v54 = vmul.f32 %v1290_v53, %v2518_v31 }
 0xb35   : > { %v1292_v55 = vsub.f32 %v2668_v49, %v1291_v54 }
 0xb37   : > { %v1293_v56 = vmul.f32 %v1292_v55, %v1292_v55 }
 0xb39   : > { %v1294_v57 = vsel %vm737_vm1, %v1293_v56, 0.0 }
 0xb3a   : > { %1295 = vadd.xlane.f32.xlu1 %v1294_v57 }
 0xbad   : > { %v1296_v60 = vpop.xlane.xlu1 %1295 }
 0xbae   : > { %v1297_v61 = vmul.f32 %v1296_v60, %v2518_v31 }
 0xbb0   : > { %v1298_v62 = vadd.f32 1e-05, %v1297_v61 }
 0xbb2   : > { %2218 = vrsqrt.f32 %v1298_v62  ;;  %vm1305_vm8 = vweird.f32 %v1298_v62 }
 0xbb8   : > { %v2219_v63 = vpop.eup %2218 }
 0xbb9   : > { %v1300_v0 = vmul.f32 %v2219_v63, %v1298_v62  ;;  %vm1306_vm7 = vweird.f32 %v2219_v63 }
 0xbba   : > { %vm1307_vm11 = vmor %vm1305_vm8, %vm1306_vm7 }
 0xbbb   : > { %v1301_v1 = vmul.f32 %v2219_v63, %v1300_v0 }
 0xbbd   : > { %v1302_v2 = vmul.f32 0.5, %v1301_v1 }
 0xbbf   : > { %v1303_v3 = vsub.f32 1.5, %v1302_v2 }
 0xbc1   : > { %v1304_v51 = vmul.f32 %v2219_v63, %v1303_v3 }
 0xbc3   : > { %v1308_v5 = vsel %vm1307_vm11, %v2219_v63, %v1304_v51 }
 0xbc4   : > { %v1309_v6 = vmul.f32 %v1308_v5, %v1292_v55 }
 0xbc6   : > { %v1313_v8 = vmul.f32 %v2182_v4, %v1309_v6 }
 0xbc8   : > { %v1317_v9 = vadd.f32 %v2183_v7, %v1313_v8 }
 0xbca   : > { %v1318_v10 = vpack.c.bf16 %v1317_v9, %v1317_v9 }
 0xbcc   : > { %2016 = vmatmul.msk.bf16.vlgmr.msrb.gmra.mxu1 %vm737_vm1, %v1318_v10 }
 0xc49   : > { %v1353_v12 = vpop.f32.mrf.mxu1 }
 0xc4a   : > { %v1354_v13 = vadd.f32 %v2184_v11, %v1353_v12 }
 0xc4c   : > { %v1357_v14 = vpack.c.bf16 %v1354_v13, %v1354_v13 }
 0xc4e   : > { %v1359_v15 = vunpack.c.l.b16 %v1357_v14 }
 0xc50   : > { %v2692_v16 = vpack.c.b16 %v1359_v15, %v1359_v15 }
 0xc51   : > { %v1355_v18 = vpop.f32.mrf.mxu1 }
 0xc52   : > { %1477 = vrot.lane.b32.xlu1 %v2692_v16, %s2312_s3  ;;  %1419 = vrot.lane.b32.xlu0 %v2692_v16, %s2309_s18  ;;  %s2909_s18 = smov 64   ;;  %s2911_s3 = smov 56  }
 0xc53   : > { %1361 = vrot.lane.b32.xlu2 %v2692_v16, %s2311_s0  ;;  %s2910_s0 = smov 40  }
 0xc5a   : > { %1535 = vrot.lane.b32.xlu1 %v2692_v16, %s2905_s22  ;;  %1417 = vrot.lane.b32.xlu0 %v2692_v16, %s2906_s23  ;;  %s1834_s23 = scalar_lea.hbm %s2864_s19, %s2445_s1  ;;  %s1826_s1 = scalar_lea.sflag [#allocation3], %s593_s27 }
 0xc5b   : > { %1475 = vrot.lane.b32.xlu2 %v2692_v16, %s2907_s2 }
 0xc62   : > { %1533 = vrot.lane.b32.xlu0 %v2692_v16, %s2908_s20 }
 0xcad   : > { %v1362_v19 = vpop.permute.xlu2 %1361 }
 0xcae   : > { %v1367_v20 = vsel %vm854_vm9, %v1362_v19, 0 }
 0xcaf   : > { %1376 = vmatpush.bf16.xpose.msra.mxu2 %v1367_v20 }
 0xcb5   : > { %v1476_v25 = vpop.permute.xlu2 %1475 }
 0xcb6   : > { %2017 = vmatmul.msk.bf16.vlgmr.msra.gmra.mxu2 %vm854_vm9, %v1357_v14 }
 0xcc4   : > { %v1478_v21 = vpop.permute.xlu1 %1477  ;;  %v1420_v22 = vpop.permute.xlu0 %1419 }
 0xcc5   : > { %v1483_v23 = vsel %vm854_vm9, %v1478_v21, 0  ;;  %v1425_v24 = vsel %vm854_vm9, %v1420_v22, 0 }
 0xcc6   : > { %1434 = vmatpush.bf16.xpose.msrb.mxu0 %v1425_v24  ;;  %1492 = vmatpush.bf16.xpose.msrb.mxu2 %v1483_v23 }
 0xccc   : > { %v1536_v26 = vpop.permute.xlu1 %1535  ;;  %v1418_v27 = vpop.permute.xlu0 %1417 }
 0xccd   : > { %v1541_v28 = vsel %vm854_vm9, %v1536_v26, 0  ;;  %2019 = vmatmul.msk.bf16.vlgmr.msrb.gmra.mxu0 %vm854_vm9, %v1418_v27  ;;  %2021 = vmatmul.msk.bf16.vlgmr.msrb.gmra.mxu2 %vm854_vm9, %v1476_v25 }
 0xcce   : > { %1550 = vmatpush.bf16.xpose.msra.mxu0 %v1541_v28 }
 0xcd4   : > { %v1534_v29 = vpop.permute.xlu0 %1533 }
 0xcdd   : > { %2023 = vmatmul.msk.bf16.vlgmr.msra.gmra.mxu0 %vm854_vm9, %v1534_v29 }
 0xd39   : > { %v1378_v30 = vpop.f32.mrf.mxu2 }
 0xd3a   : > { %v1382_v32 = vmul.f32 0.35355338, %v1378_v30 }
 0xd3c   : > { %v1383_v34 = vadd.f32 %v1382_v32, %v2573_v33 }
 0xd3e   : > { %v1384_v35 = vsel %vm854_vm9, %v1383_v34, -inf }
 0xd3f   : > { %1385 = vmax.xlane.f32.xlu2 %v1384_v35 }
 0xd41   : > { %v1380_v36 = vpop.f32.mrf.mxu2 }
 0xd4a   : > { %v1436_v37 = vpop.f32.mrf.mxu0 }
 0xd4b   : > { %v1440_v38 = vmul.f32 0.35355338, %v1436_v37 }
 0xd4d   : > { %v1441_v39 = vadd.f32 %v1440_v38, %v2573_v33 }
 0xd4f   : > { %v1442_v40 = vsel %vm854_vm9, %v1441_v39, -inf }
 0xd50   : > { %v1494_v17 = vpop.f32.mrf.mxu2  ;;  %1443 = vmax.xlane.f32.xlu1 %v1442_v40 }
 0xd51   : > { %v1498_v41 = vmul.f32 0.35355338, %v1494_v17 }
 0xd52   : > { %v1438_v42 = vpop.f32.mrf.mxu0 }
 0xd53   : > { %v1499_v43 = vadd.f32 %v1498_v41, %v2573_v33  ;;  %v2110_v41 = vld [vmem:[%s2854_s9 + $0x18] sm:$0xff]  ;;  %v2109_v42 = vld [vmem:[%s2854_s9 + $0x10] sm:$0xff] }
 0xd54   : > { %1638 = vmatpush.bf16.msra.mxu2 %v2110_v41 }
 0xd55   : > { %v1500_v44 = vsel %vm854_vm9, %v1499_v43, -inf }
 0xd56   : > { %1501 = vmax.xlane.f32.xlu0 %v1500_v44 }
 0xd58   : > { %v1496_v45 = vpop.f32.mrf.mxu2  ;;  %1639 = vmatpush.bf16.msra.mxu2 %v2109_v42 }
 0xd5a   : > { %v1552_v46 = vpop.f32.mrf.mxu0 }
 0xd5b   : > { %v1556_v47 = vmul.f32 0.35355338, %v1552_v46 }
 0xd5d   : > { %v1557_v48 = vadd.f32 %v1556_v47, %v2573_v33 }
 0xd5f   : > { %v1558_v50 = vsel %vm854_vm9, %v1557_v48, -inf }
 0xd60   : > { %1559 = vmax.xlane.f32.xlu2 %v1558_v50 }
 0xd62   : > { %v1554_v52 = vpop.f32.mrf.mxu0 }
 0xd63   : > { %v2185_v52 = vld [vmem:[%s2855_s10 + $0x1] ss:$0 sm:$0xff] }
 0xd78   : > { %1396 = vrot.lane.b32.xlu2 %v2692_v16, %s2909_s18 }
 0xd80   : > { %1570 = vrot.lane.b32.xlu2 %v2692_v16, %s2910_s0  ;;  %s2264_s0 = scalar_lea.hbm %s2864_s19, 2 }
 0xdb2   : > { %v1386_v53 = vpop.xlane.xlu2 %1385 }
 0xdb3   : > { %v1387_v54 = vsub.f32 %v1383_v34, %v1386_v53 }
 0xdb5   : > { %v1388_v55 = vmul.f32 1.442695, %v1387_v54 }
 0xdb7   : > { %2220 = vpow2.f32 %v1388_v55 }
 0xdbd   : > { %v2221_v56 = vpop.eup %2220 }
 0xdbe   : > { %v1390_v57 = vsel %vm854_vm9, %v2221_v56, 0.0 }
 0xdbf   : > { %1391 = vadd.xlane.f32.xlu1 %v1390_v57 }
 0xdc3   : > { %v1444_v58 = vpop.xlane.xlu1 %1443 }
 0xdc4   : > { %v1445_v33 = vsub.f32 %v1441_v39, %v1444_v58 }
 0xdc6   : > { %v1446_v59 = vmul.f32 1.442695, %v1445_v33 }
 0xdc8   : > { %2222 = vpow2.f32 %v1446_v59 }
 0xdc9   : > { %v1502_v62 = vpop.xlane.xlu0 %1501 }
 0xdca   : > { %v1503_v1 = vsub.f32 %v1499_v43, %v1502_v62  ;;  %v2112_v62 = vld [vmem:[%s2858_s13 + $0x18] sm:$0xff] }
 0xdcc   : > { %v1504_v3 = vmul.f32 1.442695, %v1503_v1 }
 0xdce   : > { %v2223_v60 = vpop.eup %2222 }
 0xdcf   : > { %v1448_v61 = vsel %vm854_vm9, %v2223_v60, 0.0 }
 0xdd0   : > { %1449 = vadd.xlane.f32.xlu0 %v1448_v61 }
 0xdd3   : > { %v1560_v63 = vpop.xlane.xlu2 %1559 }
 0xdd4   : > { %v1561_v0 = vsub.f32 %v1557_v48, %v1560_v63 }
 0xdd6   : > { %v1562_v2 = vmul.f32 1.442695, %v1561_v0 }
 0xdd8   : > { %2224 = vpow2.f32 %v1562_v2  ;;  %1454 = vrot.lane.b32.xlu1 %v2692_v16, %s2911_s3 }
 0xdd9   : > { %2226 = vpow2.f32 %v1504_v3 }
 0xddb   : > { %v1397_v51 = vpop.permute.xlu2 %1396 }
 0xddc   : > { %v1402_v4 = vsel %vm893_vm10, %v1397_v51, 0 }
 0xddd   : > { %1411 = vmatpush.bf16.msra.mxu3 %v1402_v4 }
 0xdde   : > { %v2225_v5 = vpop.eup %2224 }
 0xddf   : > { %v1564_v6 = vsel %vm854_vm9, %v2225_v5, 0.0  ;;  %v2227_v7 = vpop.eup %2226 }
 0xde0   : > { %1565 = vadd.xlane.f32.xlu0 %v1564_v6  ;;  %v1506_v8 = vsel %vm854_vm9, %v2227_v7, 0.0 }
 0xde3   : > { %v1571_v14 = vpop.permute.xlu2 %1570 }
 0xde4   : > { %v1576_v21 = vsel %vm893_vm10, %v1571_v14, 0  ;;  %v2116_v14 = vld [vmem:[%s2860_s15 + $0x38] sm:$0xff] }
 0xde5   : > { %1781 = vmatpush.bf16.msrb.mxu0 %v2116_v14 }
 0xde8   : > { %1507 = vadd.xlane.f32.xlu0 %v1506_v8 }
 0xdfc   : > { %1512 = vrot.lane.b32.xlu0 %v2692_v16, %s2912_s21  ;;  %s2917_s21 = sld [smem:[#allocation17_spill]] }
 0xe32   : > { %v1392_v9 = vpop.xlane.xlu1 %1391 }
 0xe33   : > { %2228 = vrcp.f32 %v1392_v9 }
 0xe39   : > { %v2229_v10 = vpop.eup %2228 }
 0xe3a   : > { %v1394_v11 = vmul.f32 %v2229_v10, %v2221_v56  ;;  %v2187_v10 = vld [vmem:[%s2857_s12 + $0x1] ss:$0 sm:$0xff] }
 0xe3c   : > { %v1395_v12 = vpack.c.bf16 %v1394_v11, %v1394_v11 }
 0xe3e   : > { %2018 = vmatmul.msk.bf16.vlgmr.msra.gmra.mxu3 %vm854_vm9, %v1395_v12 }
 0xe43   : > { %v1450_v13 = vpop.xlane.xlu0 %1449 }
 0xe44   : > { %2230 = vrcp.f32 %v1450_v13 }
 0xe4a   : > { %v2231_v15 = vpop.eup %2230  ;;  %v1455_v18 = vpop.permute.xlu1 %1454 }
 0xe4b   : > { %v1452_v19 = vmul.f32 %v2231_v15, %v2223_v60  ;;  %v1460_v20 = vsel %vm893_vm10, %v1455_v18, 0  ;;  %v2115_v15 = vld [vmem:[%s2860_s15 + $0x30] sm:$0xff]  ;;  %v2188_v18 = vld [vmem:[%s2859_s14 + $0x1] ss:$0 sm:$0xff] }
 0xe4c   : > { %1469 = vmatpush.bf16.msra.mxu1 %v1460_v20  ;;  %1782 = vmatpush.bf16.msrb.mxu0 %v2115_v15 }
 0xe4d   : > { %v1453_v22 = vpack.c.bf16 %v1452_v19, %v1452_v19  ;;  %v2114_v19 = vld [vmem:[%s2860_s15 + $0x28] sm:$0xff] }
 0xe4f   : > { %2020 = vmatmul.msk.bf16.vlgmr.msra.gmra.mxu1 %vm854_vm9, %v1453_v22  ;;  %v2113_v22 = vld [vmem:[%s2860_s15 + $0x20] sm:$0xff] }
 0xe50   : > { %1585 = vmatpush.bf16.msrb.mxu1 %v1576_v21  ;;  %1783 = vmatpush.bf16.msrb.mxu0 %v2114_v19 }
 0xe53   : > { %v1566_v16 = vpop.xlane.xlu0 %1565 }
 0xe54   : > { %2232 = vrcp.f32 %v1566_v16  ;;  %1784 = vmatpush.bf16.msrb.mxu0 %v2113_v22 }
 0xe5a   : > { %v2233_v23 = vpop.eup %2232 }
 0xe5b   : > { %v1568_v24 = vmul.f32 %v2233_v23, %v2225_v5  ;;  %v1508_v26 = vpop.xlane.xlu0 %1507 }
 0xe5c   : > { %2234 = vrcp.f32 %v1508_v26 }
 0xe5d   : > { %v1569_v25 = vpack.c.bf16 %v1568_v24, %v1568_v24 }
 0xe5f   : > { %2024 = vmatmul.msk.bf16.vlgmr.msrb.gmra.mxu1 %vm854_vm9, %v1569_v25 }
 0xe62   : > { %v2235_v27 = vpop.eup %2234 }
 0xe63   : > { %v1510_v28 = vmul.f32 %v2235_v27, %v2227_v7  ;;  %v2186_v7 = vld [vmem:[%s2856_s11 + $0x1] ss:$0 sm:$0xff] }
 0xe65   : > { %v1511_v32 = vpack.c.bf16 %v1510_v28, %v1510_v28 }
 0xe6e   : > { %v1513_v29 = vpop.permute.xlu0 %1512 }
 0xe6f   : > { %v1518_v30 = vsel %vm893_vm10, %v1513_v29, 0 }
 0xe70   : > { %1527 = vmatpush.bf16.msrb.mxu3 %v1518_v30 }
 0xe73   : > { %2022 = vmatmul.msk.bf16.vlgmr.msrb.gmra.mxu3 %vm854_vm9, %v1511_v32 }
 0xe74   : > { %1712 = vmatpush.bf16.msra.mxu3 %v2112_v62 }
 0xec1   : > { %v1413_v34 = vpop.f32.mrf.mxu3 }
 0xec9   : > { %v1415_v35 = vpop.f32.mrf.mxu3 }
 0xecc   : > { %v1471_v36 = vpop.f32.mrf.mxu1 }
 0xecd   : > { %1592 = vrot.lane.b32.xlu1 %v1471_v36, %s2913_s24  ;;  %s594_s24 = scalar_lea.vmem [#allocation2], %s593_s27 }
 0xed4   : > { %v1473_v37 = vpop.f32.mrf.mxu1 }
 0xedc   : > { %v1587_v38 = vpop.f32.mrf.mxu1 }
 0xedd   : > { %1600 = vrot.lane.b32.xlu1 %v1587_v38, %s2914_s25  ;;  %s1836_s25 = sshll.u32 %s594_s24, 4  ;;  %s1837_s25 = int_to_ptr.vmem [resolvable:$true] %s1836_s25 }
 0xee4   : > { %v1589_v39 = vpop.f32.mrf.mxu1 }
 0xef6   : > { %v1529_v40 = vpop.f32.mrf.mxu3 }
 0xef7   : > { %1596 = vrot.lane.b32.xlu2 %v1529_v40, %s2915_s26  ;;  %s1838_s26 = sshll.u32 %s1834_s23, 4  ;;  %s1839_s26 = int_to_ptr.hbm [resolvable:$true] %s1838_s26 }
 0xef8   : > { %s2258_s28 = sshra.s32 %s1839_s26, 4  ;;  %s2259_s28 = int_to_ptr.hbm [resolvable:$true] %s2258_s28 }
 0xef9   : > { %s2260_s22 = scalar_lea.hbm %s2259_s28, 1  ;;  %p2265_p0 = scmp.lt.s32.totalorder %s2259_s28, %s2864_s19 }
 0xefa   : > { %p2261_p11 = scmp.ne.s32.totalorder %s2259_s28, %s2260_s22  ;;  %p2266_p1 = scmp.lt.s32.totalorder %s2264_s0, %s2260_s22 }
 0xefc   : > { %p2262_p12 = pnand %p2261_p11, %p2462_p5  ;;  %p2267_p2 = por %p2266_p1, %p2265_p0 }
 0xefe   : > { %v1531_v17 = vpop.f32.mrf.mxu3  ;;  %p2263_p13 = pneg %p2262_p12 }
 0xeff   : > { %v2189_v17 = vld [vmem:[%s2861_s16 + $0x1] ss:$0 sm:$0xff] }
 0xf00   : > { %p2268_p3 = pnand %p2267_p2, %p2263_p13 }
 0xf3f   : > { %v1593_v43 = vpop.permute.xlu1 %1592 }
 0xf40   : > { %v1603_v44 = vsel %vm854_vm9, %v1413_v34, %v1593_v43 }
 0xf4f   : > { %v1601_v46 = vpop.permute.xlu1 %1600 }
 0xf51   : > { %v1597_v45 = vpop.permute.xlu2 %1596 }
 0xf52   : > { %v1604_v47 = vsel %vm1097_vm12, %v1603_v44, %v1597_v45 }
 0xf53   : > { %v1605_v48 = vsel %vm1099_vm13, %v1604_v47, %v1601_v46 }
 0xf54   : > { %v1606_v50 = vpack.c.bf16 %v1605_v48, %v1605_v48 }
 0xf56   : > { %2038 = vmatmul.msk.bf16.vlgmr.msra.gmra.mxu2 %vm737_vm1, %v1606_v50 }
 0xfd9   : > { %v1641_v53 = vpop.f32.mrf.mxu2 }
 0xfda   : > { %v1642_v54 = vadd.f32 %v2185_v52, %v1641_v53 }
 0xfdc   : > { %v2761_v55 = vadd.f32 %v1642_v54, %v2668_v49  ;;  %v2111_v49 = vld [vmem:[%s2858_s13 + $0x10] sm:$0xff] }
 0xfdd   : > { %1713 = vmatpush.bf16.msra.mxu3 %v2111_v49  ;;  %v1798_v49 = vld [vmem:[%s2917_s21] sm:$0x1] }
 0xfde   : > { %v1650_v56 = vsel %vm737_vm1, %v2761_v55, 0.0 }
 0xfdf   : > { %1651 = vadd.xlane.f32.xlu2 %v1650_v56 }
 0xfe1   : > { %v1643_v57 = vpop.f32.mrf.mxu2 }
0x1052   : > { %v1652_v58 = vpop.xlane.xlu2 %1651 }
0x1053   : > { %v1653_v33 = vmul.f32 %v1652_v58, %v2518_v31 }
0x1055   : > { %v1654_v59 = vsub.f32 %v2761_v55, %v1653_v33 }
0x1057   : > { %v1655_v60 = vmul.f32 %v1654_v59, %v1654_v59 }
0x1059   : > { %v1656_v61 = vsel %vm737_vm1, %v1655_v60, 0.0 }
0x105a   : > { %1657 = vadd.xlane.f32.xlu0 %v1656_v61 }
0x10cd   : > { %v1658_v63 = vpop.xlane.xlu0 %1657 }
0x10ce   : > { %v1659_v0 = vmul.f32 %v1658_v63, %v2518_v31 }
0x10d0   : > { %v1660_v1 = vadd.f32 1e-05, %v1659_v0 }
0x10d2   : > { %2236 = vrsqrt.f32 %v1660_v1  ;;  %vm1667_vm10 = vweird.f32 %v1660_v1 }
0x10d8   : > { %v2237_v2 = vpop.eup %2236 }
0x10d9   : > { %v1662_v3 = vmul.f32 %v2237_v2, %v1660_v1  ;;  %vm1668_vm9 = vweird.f32 %v2237_v2 }
0x10da   : > { %vm1669_vm12 = vmor %vm1667_vm10, %vm1668_vm9 }
0x10db   : > { %v1663_v51 = vmul.f32 %v2237_v2, %v1662_v3 }
0x10dd   : > { %v1664_v4 = vmul.f32 0.5, %v1663_v51 }
0x10df   : > { %v1665_v5 = vsub.f32 1.5, %v1664_v4 }
0x10e1   : > { %v1666_v6 = vmul.f32 %v2237_v2, %v1665_v5 }
0x10e3   : > { %v1670_v8 = vsel %vm1669_vm12, %v2237_v2, %v1666_v6 }
0x10e4   : > { %v1671_v9 = vmul.f32 %v1670_v8, %v1654_v59 }
0x10e6   : > { %v1675_v11 = vmul.f32 %v2186_v7, %v1671_v9 }
0x10e8   : > { %v1679_v12 = vadd.f32 %v2187_v10, %v1675_v11 }
0x10ea   : > { %v1680_v13 = vpack.c.bf16 %v1679_v12, %v1679_v12 }
0x10ec   : > { %2054 = vmatmul.msk.bf16.vlgmr.msra.gmra.mxu3 %vm737_vm1, %v1680_v13 }
0x116f   : > { %v1715_v20 = vpop.f32.mrf.mxu3 }
0x1170   : > { %v1716_v21 = vadd.f32 %v2188_v18, %v1715_v20 }
0x1172   : > { %v2055_v16 = vmul.f32 -1.702, %v1716_v21 }
0x1174   : > { %v1721_v23 = vmul.f32 1.442695, %v2055_v16 }
0x1176   : > { %2238 = vpow2.f32 %v1721_v23 }
0x1177   : > { %v1717_v24 = vpop.f32.mrf.mxu3 }
0x117c   : > { %v2239_v25 = vpop.eup %2238 }
0x117d   : > { %v1723_v26 = vadd.f32 1.0, %v2239_v25 }
0x117f   : > { %2240 = vrcp.f32 %v1723_v26  ;;  %v1735_v30 = vand.u32 2147483648, %v1723_v26  ;;  %v1733_v34 = vand.u32 2147483647, %v1723_v26  ;;  %vm1729_vm13 = vweird.f32 %v1723_v26 }
0x1181   : > { %v1736_v36 = vor.u32 1.1754944e-38, %v1735_v30  ;;  %vm1734_vm15 = vcmp.eq.f32.partialorder %v1733_v34, 8.507059e+37 }
0x1185   : > { %v2241_v27 = vpop.eup %2240 }
0x1186   : > { %v1725_v28 = vmul.f32 %v2241_v27, %v1723_v26  ;;  %vm1730_vm1 = vweird.f32 %v2241_v27 }
0x1187   : > { %vm1731_vm14 = vmor %vm1729_vm13, %vm1730_vm1 }
0x1188   : > { %v1726_v29 = vsub.f32 1.0, %v1725_v28 }
0x118a   : > { %v1727_v32 = vmul.f32 %v2241_v27, %v1726_v29 }
0x118c   : > { %v1728_v35 = vadd.f32 %v2241_v27, %v1727_v32 }
0x118e   : > { %v1732_v37 = vsel %vm1731_vm14, %v2241_v27, %v1728_v35 }
0x118f   : > { %v1737_v38 = vsel %vm1734_vm15, %v1736_v36, %v1732_v37 }
0x1190   : > { %v1739_v39 = vmul.f32 %v1737_v38, %v1716_v21 }
0x1192   : > { %v1740_v40 = vpack.c.bf16 %v1739_v39, %v1739_v39 }
0x1194   : > { %2080 = vmatmul.msk.bf16.vlgmr.msrb.gmra.mxu0 %vm705_vm0, %v1740_v40 }
0x1211   : > { %v1786_v41 = vpop.f32.mrf.mxu0 }
0x1212   : > { %v1790_v42 = vadd.f32 %v1786_v41, %v2761_v55 }
0x1214   : > { %v1796_v43 = vadd.f32 %v2189_v17, %v1790_v42 }
0x1216   : > { %v1800_v44 = vsel %vm1799_vm2, %v1796_v43, 0.0 }
0x1217   : > { %1801 = vadd.xlane.f32.xlu1 %v1800_v44 }
0x1219   : > { %v1788_v45 = vpop.f32.mrf.mxu0 }
0x128a   : > { %v1802_v46 = vpop.xlane.xlu1 %1801 }
0x128b   : > { %v1803_v47 = vmul.f32 %v1802_v46, %v2518_v31 }
0x128d   : > { %v1804_v48 = vsub.f32 %v1796_v43, %v1803_v47 }
0x128f   : > { %v1805_v50 = vmul.f32 %v1804_v48, %v1804_v48 }
0x1291   : > { %v1806_v52 = vsel %vm1799_vm2, %v1805_v50, 0.0 }
0x1292   : > { %1807 = vadd.xlane.f32.xlu2 %v1806_v52 }
0x1305   : > { %v1808_v53 = vpop.xlane.xlu2 %1807 }
0x1306   : > { %v1809_v54 = vmul.f32 %v1808_v53, %v2518_v31  ;;  %v1797_v31 = vld [vmem:[%s2862_s17] sm:$0x1] }
0x1308   : > { %v1810_v55 = vadd.f32 1e-05, %v1809_v54 }
0x130a   : > { %2242 = vrsqrt.f32 %v1810_v55  ;;  %vm1817_vm3 = vweird.f32 %v1810_v55 }
0x1310   : > { %v2243_v56 = vpop.eup %2242 }
0x1311   : > { %v1812_v57 = vmul.f32 %v2243_v56, %v1810_v55  ;;  %vm1818_vm0 = vweird.f32 %v2243_v56 }
0x1312   : > { %vm1819_vm4 = vmor %vm1817_vm3, %vm1818_vm0 }
0x1313   : > { %v1813_v58 = vmul.f32 %v2243_v56, %v1812_v57 }
0x1315   : > { %v1814_v33 = vmul.f32 0.5, %v1813_v58 }
0x1317   : > { %v1815_v59 = vsub.f32 1.5, %v1814_v33 }
0x1319   : > { %v1816_v60 = vmul.f32 %v2243_v56, %v1815_v59 }
0x131b   : > { %v1820_v61 = vsel %vm1819_vm4, %v2243_v56, %v1816_v60 }
0x131c   : > { %v1821_v62 = vmul.f32 %v1820_v61, %v1804_v48 }
0x131e   : > { %v1822_v63 = vmul.f32 %v1821_v62, %v1797_v31 }
0x1320   : > { %v1823_v0 = vadd.f32 %v1822_v63, %v1798_v49 }
0x1322   : > { %1824 = vst.msk [vmem:[%s594_s24] sm:$0x1] %vm1799_vm2, %v1823_v0 }
0x1323   : > { %2271 = shalt.err (!%p2268_p3)
}
0x1324   : > { %2117 = dma.vmem_to_hbm [thread:$0]  (%p2462_p5), %s1837_s25, 16, %s1839_s26, %s1826_s1  }
0x1325 PF: > { %s2918_s27 = sld [smem:[#allocation7_spill]] }
0x1326   : > { %s2919_s21 = sld [smem:[#allocation5_spill]] }
0x132b   : > { %p2123_p4 = scmp.ge.s32.totalorder %s2918_s27, 2 }
0x132c   : > { %s1850_s4 = sand.u32 1, %s2919_s21  }
0x132d   : > { %p2120_p7 = pnand %p2123_p4, %p2466_p6  ;;  %s1851_s2 = scalar_lea.sflag [#allocation3], %s1850_s4 }
0x132f   : > { %p2121_p8 = pneg %p2120_p7 }
0x1331   : > { %2289 = dma.done.wait (%p2121_p8), %s1851_s2, 16  }
0x1332   : > { %2291 = vsyncadd (%p2121_p8), %s1851_s2, 4294967280  ;;  %s2921_s21 = sld [smem:[#allocation8_spill]]  ;;  %s2924_s0 = smov %s2298_s30 }
0x1333   : > { %s2922_s28 = sld [smem:[#allocation6_spill]] }
0x1334   : > { %s2923_s20 = sld [smem:[#allocation9_spill]] }
0x1338   : > { %p29_p9 = scmp.ge.s32.totalorder %s2921_s21, 4  }
0x1339   : > { %s2925_s30 = smov %s2922_s28 }
0x133a   :  { %31 = sbr.rel (!%p29_p9) target bundleno = 10 (0xa), region = 143 }
0x133f   :  { %1856 = vsyncpa [#allocation3], 1 }
0x1340   :  { %1858 = vsyncpa [#allocation3 + $0x1], 1 }

</bundles_post_ra>
